<compile_context>
chip_gen: v7x
topology: tpu7x:2x2x1
jax: 0.10.0
libtpu: 0.0.40
codegen_flags: <defaults>
</compile_context>

<pallas_src>
import functools

import jax
import jax.numpy as jnp
from jax import lax
from jax.experimental import pallas as pl
from jax.experimental.pallas import tpu as pltpu


def _lstm_cls_kernel(x_ref, w_ih_ref, b_ref, w_hh_ref, fcw_ref, fcb_ref,
                     out_ref, zin_sc, *, seq_len, batch, hidden_size):
    H = hidden_size
    B = batch  # padded batch (multiple of 8)

    # (1) One big MXU call: input projection for all timesteps + folded bias.
    #     Rows [t*B : (t+1)*B] of zin_sc hold the pre-activations of step t.
    zin_sc[...] = (jnp.dot(x_ref[...], w_ih_ref[...],
                           preferred_element_type=jnp.float32)
                   + b_ref[...])

    w_hh = w_hh_ref[...]  # (H, 4H), resident for the whole recurrence

    def step(t, carry):
        h_prev, c_prev = carry
        row0 = pl.multiple_of(t * B, B)  # sublane-aligned slice start
        z = zin_sc[pl.ds(row0, B), :] + jnp.dot(
            h_prev, w_hh, preferred_element_type=jnp.float32)  # (B, 4H)

        # Packed gate order: [f, i, o, g]
        f_g = jax.nn.sigmoid(z[:, 0 * H:1 * H])
        i_g = jax.nn.sigmoid(z[:, 1 * H:2 * H])
        o_g = jax.nn.sigmoid(z[:, 2 * H:3 * H])
        g_g = jnp.tanh(z[:, 3 * H:4 * H])

        c_new = f_g * c_prev + i_g * g_g
        h_new = o_g * jnp.tanh(c_new)
        return h_new, c_new

    h0 = jnp.zeros((B, H), jnp.float32)
    c0 = jnp.zeros((B, H), jnp.float32)
    h_final, _ = lax.fori_loop(0, seq_len, step, (h0, c0), unroll=True)

    # Final classifier head: fc(h_final). Output block is (B, 128) lane-dense.
    logits = (jnp.dot(h_final, fcw_ref[...],
                      preferred_element_type=jnp.float32)
              + fcb_ref[...])
    out_ref[...] = logits.astype(out_ref.dtype)


def _round_up(n, m):
    return ((n + m - 1) // m) * m


def lstm_classifier_forward(x, params):
    """x: (seq_len, batch, input_size) -> (batch, classes)."""
    seq_len, batch, input_size = x.shape
    w_ih, b_ih, w_hh, b_hh, fc_w, fc_b = params
    hidden_size = w_hh.shape[0]
    classes = fc_w.shape[1]

    # ---- wrapper-side zero padding (exact results preserved) ----
    B_p = _round_up(max(batch, 8), 8)          # fill sublanes / MXU rows
    I_p = _round_up(input_size, 8)             # 28 -> 32
    C_p = _round_up(max(classes, 128), 128)    # lane-dense output store

    x_p = jnp.zeros((seq_len, B_p, I_p), jnp.float32)
    x_p = x_p.at[:, :batch, :input_size].set(x.astype(jnp.float32))
    # Present the input as a 2-D (seq*B_p, I_p) slab so no in-kernel reshape
    # is needed for the batched input projection.
    x2d = x_p.reshape(seq_len * B_p, I_p)

    w_ih_p = jnp.zeros((I_p, 4 * hidden_size), jnp.float32)
    w_ih_p = w_ih_p.at[:input_size, :].set(w_ih.astype(jnp.float32))
    b_fold = (b_ih + b_hh).reshape(1, 4 * hidden_size).astype(jnp.float32)

    fc_w_p = jnp.zeros((hidden_size, C_p), jnp.float32)
    fc_w_p = fc_w_p.at[:, :classes].set(fc_w.astype(jnp.float32))
    fc_b_p = jnp.zeros((1, C_p), jnp.float32)
    fc_b_p = fc_b_p.at[:, :classes].set(fc_b.astype(jnp.float32))

    kernel = functools.partial(_lstm_cls_kernel, seq_len=seq_len,
                               batch=B_p, hidden_size=hidden_size)

    grid_spec = pltpu.PrefetchScalarGridSpec(
        num_scalar_prefetch=0,
        grid=(1,),  # single step; the recurrence is an in-kernel unrolled loop
        in_specs=[
            pl.BlockSpec((seq_len * B_p, I_p), lambda i: (0, 0)),       # x slab
            pl.BlockSpec((I_p, 4 * hidden_size), lambda i: (0, 0)),     # w_ih
            pl.BlockSpec((1, 4 * hidden_size), lambda i: (0, 0)),       # b folded
            pl.BlockSpec((hidden_size, 4 * hidden_size), lambda i: (0, 0)),  # w_hh
            pl.BlockSpec((hidden_size, C_p), lambda i: (0, 0)),         # fc_w
            pl.BlockSpec((1, C_p), lambda i: (0, 0)),                   # fc_b
        ],
        out_specs=pl.BlockSpec((B_p, C_p), lambda i: (0, 0)),
        scratch_shapes=[
            pltpu.VMEM((seq_len * B_p, 4 * hidden_size), jnp.float32),  # z_in slab
        ],
    )

    out_p = pl.pallas_call(
        kernel,
        out_shape=jax.ShapeDtypeStruct((B_p, C_p), jnp.float32),
        grid_spec=grid_spec,
        compiler_params=pltpu.CompilerParams(
            dimension_semantics=("arbitrary",)),
        # TODO(synk): if hidden_size scales (w_hh = H*4H*4 bytes), set
        # vmem_limit_bytes / K-tile w_hh and consider bf16 weights for v7x's
        # 64 MiB VMEM.
    )(x2d, w_ih_p, b_fold, w_hh, fc_w_p, fc_b_p)

    return out_p[:batch, :classes]


def init_params(key, input_size, hidden_size, classes):
    """Deterministic synthetic weights (PyTorch-Linear-style uniform init),
    packed per-gate in order [f, i, o, g]."""
    ks = jax.random.split(key, 6)

    def uni(k, shape, fan_in):
        bound = 1.0 / jnp.sqrt(fan_in)
        return jax.random.uniform(k, shape, jnp.float32, -bound, bound)

    w_ih = uni(ks[0], (input_size, 4 * hidden_size), input_size)
    b_ih = uni(ks[1], (1, 4 * hidden_size), input_size)
    w_hh = uni(ks[2], (hidden_size, 4 * hidden_size), hidden_size)
    b_hh = uni(ks[3], (1, 4 * hidden_size), hidden_size)
    fc_w = uni(ks[4], (hidden_size, classes), hidden_size)
    fc_b = uni(ks[5], (1, classes), hidden_size)
    return w_ih, b_ih, w_hh, b_hh, fc_w, fc_b


def reference_forward(x, params):
    """Pure-JAX reference matching the PyTorch module semantics."""
    w_ih, b_ih, w_hh, b_hh, fc_w, fc_b = params
    hidden_size = w_hh.shape[0]
    seq_len, batch, _ = x.shape
    h = jnp.zeros((batch, hidden_size), jnp.float32)
    c = jnp.zeros((batch, hidden_size), jnp.float32)
    H = hidden_size
    for t in range(seq_len):
        z = x[t] @ w_ih + h @ w_hh + b_ih + b_hh
        f = jax.nn.sigmoid(z[:, 0 * H:1 * H])
        i = jax.nn.sigmoid(z[:, 1 * H:2 * H])
        o = jax.nn.sigmoid(z[:, 2 * H:3 * H])
        g = jnp.tanh(z[:, 3 * H:4 * H])
        c = f * c + i * g
        h = o * jnp.tanh(c)
    return h @ fc_w + fc_b


if __name__ == "__main__":
    seq_len, batch, input_size = 8, 2, 28
    hidden_size, classes = 128, 10

    key = jax.random.PRNGKey(0)
    kx, kp = jax.random.split(key)
    x = jax.random.normal(kx, (seq_len, batch, input_size), jnp.float32)
    params = init_params(kp, input_size, hidden_size, classes)

    out = lstm_classifier_forward(x, params)
    out = jax.block_until_ready(out)

    ref = reference_forward(x, params)
    assert out.shape == (batch, classes)
    assert jnp.allclose(out, ref, atol=1e-4, rtol=1e-4), "mismatch vs reference"

    print("KERNEL_OK")
</pallas_src>

<mosaic_0001>
module attributes {stable_mosaic.version = 11 : i64} {
  func.func @_lstm_cls_kernel(%arg0: i32, %arg1: memref<64x32xf32, #tpu.memory_space<vmem>>, %arg2: memref<32x512xf32, #tpu.memory_space<vmem>>, %arg3: memref<1x512xf32, #tpu.memory_space<vmem>>, %arg4: memref<128x512xf32, #tpu.memory_space<vmem>>, %arg5: memref<128x128xf32, #tpu.memory_space<vmem>>, %arg6: memref<1x128xf32, #tpu.memory_space<vmem>>, %arg7: memref<8x128xf32, #tpu.memory_space<vmem>>, %arg8: memref<64x512xf32, #tpu.memory_space<vmem>>) attributes {dimension_semantics = [#tpu.dimension_semantics<arbitrary>], iteration_bounds = array<i64: 1>, scalar_prefetch = 0 : i64, scratch_operands = 1 : i64, tpu.core_type = #tpu.core_type<tc>, window_params = [{pipeline_mode = #tpu.pipeline_mode<synchronous>, transform_indices = @transform_0, window_bounds = array<i64: 64, 32>}, {pipeline_mode = #tpu.pipeline_mode<synchronous>, transform_indices = @transform_1, window_bounds = array<i64: 32, 512>}, {pipeline_mode = #tpu.pipeline_mode<synchronous>, transform_indices = @transform_2, window_bounds = array<i64: 1, 512>}, {pipeline_mode = #tpu.pipeline_mode<synchronous>, transform_indices = @transform_3, window_bounds = array<i64: 128, 512>}, {pipeline_mode = #tpu.pipeline_mode<synchronous>, transform_indices = @transform_4, window_bounds = array<i64: 128, 128>}, {pipeline_mode = #tpu.pipeline_mode<synchronous>, transform_indices = @transform_5, window_bounds = array<i64: 1, 128>}, {pipeline_mode = #tpu.pipeline_mode<synchronous>, transform_indices = @transform_6, window_bounds = array<i64: 8, 128>}]} {
    %c0 = arith.constant 0 : index
    %c0_0 = arith.constant 0 : index
    %0 = vector.load %arg1[%c0, %c0_0] : memref<64x32xf32, #tpu.memory_space<vmem>>, vector<64x32xf32>
    %c0_1 = arith.constant 0 : index
    %c0_2 = arith.constant 0 : index
    %1 = vector.load %arg2[%c0_1, %c0_2] : memref<32x512xf32, #tpu.memory_space<vmem>>, vector<32x512xf32>
    %cst = arith.constant dense<0.000000e+00> : vector<64x512xf32>
    %2 = tpu.matmul %0, %1, %cst {dimension_numbers = #tpu.dot_dimension_numbers<[1], [0], [0], [1], [0, 0, 1, 1], [], []>} : vector<64x32xf32>, vector<32x512xf32>, vector<64x512xf32> -> vector<64x512xf32>
    %c0_3 = arith.constant 0 : index
    %c0_4 = arith.constant 0 : index
    %3 = vector.load %arg3[%c0_3, %c0_4] : memref<1x512xf32, #tpu.memory_space<vmem>>, vector<1x512xf32>
    %4 = vector.broadcast %3 : vector<1x512xf32> to vector<64x512xf32>
    %5 = arith.addf %2, %4 : vector<64x512xf32>
    %c0_5 = arith.constant 0 : index
    %c0_6 = arith.constant 0 : index
    %6 = vector.load %arg8[%c0_5, %c0_6] : memref<64x512xf32, #tpu.memory_space<vmem>>, vector<64x512xf32>
    tpu.vector_store %arg8[%c0_5, %c0_6], %5 {strides = array<i32>} : memref<64x512xf32, #tpu.memory_space<vmem>>, vector<64x512xf32>,
    %c0_7 = arith.constant 0 : index
    %c0_8 = arith.constant 0 : index
    %7 = vector.load %arg4[%c0_7, %c0_8] : memref<128x512xf32, #tpu.memory_space<vmem>>, vector<128x512xf32>
    %cst_9 = arith.constant 0.000000e+00 : f32
    %8 = vector.broadcast %cst_9 : f32 to vector<8x128xf32>
    %cst_10 = arith.constant 0.000000e+00 : f32
    %9 = vector.broadcast %cst_10 : f32 to vector<8x128xf32>
    %c0_i32 = arith.constant 0 : i32
    %c8_i32 = arith.constant 8 : i32
    %10 = arith.muli %c0_i32, %c8_i32 : i32
    %11 = tpu.assume_multiple %10, 8 : i32
    %12 = arith.index_cast %11 : i32 to index
    %c0_11 = arith.constant 0 : index
    %13 = vector.load %arg8[%12, %c0_11] : memref<64x512xf32, #tpu.memory_space<vmem>>, vector<8x512xf32>
    %cst_12 = arith.constant dense<0.000000e+00> : vector<8x512xf32>
    %14 = tpu.matmul %8, %7, %cst_12 {dimension_numbers = #tpu.dot_dimension_numbers<[1], [0], [0], [1], [0, 0, 1, 1], [], []>} : vector<8x128xf32>, vector<128x512xf32>, vector<8x512xf32> -> vector<8x512xf32>
    %15 = arith.addf %13, %14 : vector<8x512xf32>
    %16 = vector.extract_strided_slice %15 {offsets = [0, 0], sizes = [8, 128], strides = [1, 1]} : vector<8x512xf32> to vector<8x128xf32>
    %17 = arith.negf %16 : vector<8x128xf32>
    %18 = math.exp %17 : vector<8x128xf32>
    %cst_13 = arith.constant 1.000000e+00 : f32
    %19 = vector.broadcast %cst_13 : f32 to vector<8x128xf32>
    %20 = arith.addf %19, %18 : vector<8x128xf32>
    %21 = arith.divf %19, %20 : vector<8x128xf32>
    %22 = vector.extract_strided_slice %15 {offsets = [0, 128], sizes = [8, 128], strides = [1, 1]} : vector<8x512xf32> to vector<8x128xf32>
    %23 = arith.negf %22 : vector<8x128xf32>
    %24 = math.exp %23 : vector<8x128xf32>
    %cst_14 = arith.constant 1.000000e+00 : f32
    %25 = vector.broadcast %cst_14 : f32 to vector<8x128xf32>
    %26 = arith.addf %25, %24 : vector<8x128xf32>
    %27 = arith.divf %25, %26 : vector<8x128xf32>
    %28 = vector.extract_strided_slice %15 {offsets = [0, 256], sizes = [8, 128], strides = [1, 1]} : vector<8x512xf32> to vector<8x128xf32>
    %29 = arith.negf %28 : vector<8x128xf32>
    %30 = math.exp %29 : vector<8x128xf32>
    %cst_15 = arith.constant 1.000000e+00 : f32
    %31 = vector.broadcast %cst_15 : f32 to vector<8x128xf32>
    %32 = arith.addf %31, %30 : vector<8x128xf32>
    %33 = arith.divf %31, %32 : vector<8x128xf32>
    %34 = vector.extract_strided_slice %15 {offsets = [0, 384], sizes = [8, 128], strides = [1, 1]} : vector<8x512xf32> to vector<8x128xf32>
    %35 = math.tanh %34 : vector<8x128xf32>
    %36 = arith.mulf %21, %9 : vector<8x128xf32>
    %37 = arith.mulf %27, %35 : vector<8x128xf32>
    %38 = arith.addf %36, %37 : vector<8x128xf32>
    %39 = math.tanh %38 : vector<8x128xf32>
    %40 = arith.mulf %33, %39 : vector<8x128xf32>
    %c1_i32 = arith.constant 1 : i32
    %c8_i32_16 = arith.constant 8 : i32
    %41 = arith.muli %c1_i32, %c8_i32_16 : i32
    %42 = tpu.assume_multiple %41, 8 : i32
    %43 = arith.index_cast %42 : i32 to index
    %c0_17 = arith.constant 0 : index
    %44 = vector.load %arg8[%43, %c0_17] : memref<64x512xf32, #tpu.memory_space<vmem>>, vector<8x512xf32>
    %cst_18 = arith.constant dense<0.000000e+00> : vector<8x512xf32>
    %45 = tpu.matmul %40, %7, %cst_18 {dimension_numbers = #tpu.dot_dimension_numbers<[1], [0], [0], [1], [0, 0, 1, 1], [], []>} : vector<8x128xf32>, vector<128x512xf32>, vector<8x512xf32> -> vector<8x512xf32>
    %46 = arith.addf %44, %45 : vector<8x512xf32>
    %47 = vector.extract_strided_slice %46 {offsets = [0, 0], sizes = [8, 128], strides = [1, 1]} : vector<8x512xf32> to vector<8x128xf32>
    %48 = arith.negf %47 : vector<8x128xf32>
    %49 = math.exp %48 : vector<8x128xf32>
    %cst_19 = arith.constant 1.000000e+00 : f32
    %50 = vector.broadcast %cst_19 : f32 to vector<8x128xf32>
    %51 = arith.addf %50, %49 : vector<8x128xf32>
    %52 = arith.divf %50, %51 : vector<8x128xf32>
    %53 = vector.extract_strided_slice %46 {offsets = [0, 128], sizes = [8, 128], strides = [1, 1]} : vector<8x512xf32> to vector<8x128xf32>
    %54 = arith.negf %53 : vector<8x128xf32>
    %55 = math.exp %54 : vector<8x128xf32>
    %cst_20 = arith.constant 1.000000e+00 : f32
    %56 = vector.broadcast %cst_20 : f32 to vector<8x128xf32>
    %57 = arith.addf %56, %55 : vector<8x128xf32>
    %58 = arith.divf %56, %57 : vector<8x128xf32>
    %59 = vector.extract_strided_slice %46 {offsets = [0, 256], sizes = [8, 128], strides = [1, 1]} : vector<8x512xf32> to vector<8x128xf32>
    %60 = arith.negf %59 : vector<8x128xf32>
    %61 = math.exp %60 : vector<8x128xf32>
    %cst_21 = arith.constant 1.000000e+00 : f32
    %62 = vector.broadcast %cst_21 : f32 to vector<8x128xf32>
    %63 = arith.addf %62, %61 : vector<8x128xf32>
    %64 = arith.divf %62, %63 : vector<8x128xf32>
    %65 = vector.extract_strided_slice %46 {offsets = [0, 384], sizes = [8, 128], strides = [1, 1]} : vector<8x512xf32> to vector<8x128xf32>
    %66 = math.tanh %65 : vector<8x128xf32>
    %67 = arith.mulf %52, %38 : vector<8x128xf32>
    %68 = arith.mulf %58, %66 : vector<8x128xf32>
    %69 = arith.addf %67, %68 : vector<8x128xf32>
    %70 = math.tanh %69 : vector<8x128xf32>
    %71 = arith.mulf %64, %70 : vector<8x128xf32>
    %c2_i32 = arith.constant 2 : i32
    %c8_i32_22 = arith.constant 8 : i32
    %72 = arith.muli %c2_i32, %c8_i32_22 : i32
    %73 = tpu.assume_multiple %72, 8 : i32
    %74 = arith.index_cast %73 : i32 to index
    %c0_23 = arith.constant 0 : index
    %75 = vector.load %arg8[%74, %c0_23] : memref<64x512xf32, #tpu.memory_space<vmem>>, vector<8x512xf32>
    %cst_24 = arith.constant dense<0.000000e+00> : vector<8x512xf32>
    %76 = tpu.matmul %71, %7, %cst_24 {dimension_numbers = #tpu.dot_dimension_numbers<[1], [0], [0], [1], [0, 0, 1, 1], [], []>} : vector<8x128xf32>, vector<128x512xf32>, vector<8x512xf32> -> vector<8x512xf32>
    %77 = arith.addf %75, %76 : vector<8x512xf32>
    %78 = vector.extract_strided_slice %77 {offsets = [0, 0], sizes = [8, 128], strides = [1, 1]} : vector<8x512xf32> to vector<8x128xf32>
    %79 = arith.negf %78 : vector<8x128xf32>
    %80 = math.exp %79 : vector<8x128xf32>
    %cst_25 = arith.constant 1.000000e+00 : f32
    %81 = vector.broadcast %cst_25 : f32 to vector<8x128xf32>
    %82 = arith.addf %81, %80 : vector<8x128xf32>
    %83 = arith.divf %81, %82 : vector<8x128xf32>
    %84 = vector.extract_strided_slice %77 {offsets = [0, 128], sizes = [8, 128], strides = [1, 1]} : vector<8x512xf32> to vector<8x128xf32>
    %85 = arith.negf %84 : vector<8x128xf32>
    %86 = math.exp %85 : vector<8x128xf32>
    %cst_26 = arith.constant 1.000000e+00 : f32
    %87 = vector.broadcast %cst_26 : f32 to vector<8x128xf32>
    %88 = arith.addf %87, %86 : vector<8x128xf32>
    %89 = arith.divf %87, %88 : vector<8x128xf32>
    %90 = vector.extract_strided_slice %77 {offsets = [0, 256], sizes = [8, 128], strides = [1, 1]} : vector<8x512xf32> to vector<8x128xf32>
    %91 = arith.negf %90 : vector<8x128xf32>
    %92 = math.exp %91 : vector<8x128xf32>
    %cst_27 = arith.constant 1.000000e+00 : f32
    %93 = vector.broadcast %cst_27 : f32 to vector<8x128xf32>
    %94 = arith.addf %93, %92 : vector<8x128xf32>
    %95 = arith.divf %93, %94 : vector<8x128xf32>
    %96 = vector.extract_strided_slice %77 {offsets = [0, 384], sizes = [8, 128], strides = [1, 1]} : vector<8x512xf32> to vector<8x128xf32>
    %97 = math.tanh %96 : vector<8x128xf32>
    %98 = arith.mulf %83, %69 : vector<8x128xf32>
    %99 = arith.mulf %89, %97 : vector<8x128xf32>
    %100 = arith.addf %98, %99 : vector<8x128xf32>
    %101 = math.tanh %100 : vector<8x128xf32>
    %102 = arith.mulf %95, %101 : vector<8x128xf32>
    %c3_i32 = arith.constant 3 : i32
    %c8_i32_28 = arith.constant 8 : i32
    %103 = arith.muli %c3_i32, %c8_i32_28 : i32
    %104 = tpu.assume_multiple %103, 8 : i32
    %105 = arith.index_cast %104 : i32 to index
    %c0_29 = arith.constant 0 : index
    %106 = vector.load %arg8[%105, %c0_29] : memref<64x512xf32, #tpu.memory_space<vmem>>, vector<8x512xf32>
    %cst_30 = arith.constant dense<0.000000e+00> : vector<8x512xf32>
    %107 = tpu.matmul %102, %7, %cst_30 {dimension_numbers = #tpu.dot_dimension_numbers<[1], [0], [0], [1], [0, 0, 1, 1], [], []>} : vector<8x128xf32>, vector<128x512xf32>, vector<8x512xf32> -> vector<8x512xf32>
    %108 = arith.addf %106, %107 : vector<8x512xf32>
    %109 = vector.extract_strided_slice %108 {offsets = [0, 0], sizes = [8, 128], strides = [1, 1]} : vector<8x512xf32> to vector<8x128xf32>
    %110 = arith.negf %109 : vector<8x128xf32>
    %111 = math.exp %110 : vector<8x128xf32>
    %cst_31 = arith.constant 1.000000e+00 : f32
    %112 = vector.broadcast %cst_31 : f32 to vector<8x128xf32>
    %113 = arith.addf %112, %111 : vector<8x128xf32>
    %114 = arith.divf %112, %113 : vector<8x128xf32>
    %115 = vector.extract_strided_slice %108 {offsets = [0, 128], sizes = [8, 128], strides = [1, 1]} : vector<8x512xf32> to vector<8x128xf32>
    %116 = arith.negf %115 : vector<8x128xf32>
    %117 = math.exp %116 : vector<8x128xf32>
    %cst_32 = arith.constant 1.000000e+00 : f32
    %118 = vector.broadcast %cst_32 : f32 to vector<8x128xf32>
    %119 = arith.addf %118, %117 : vector<8x128xf32>
    %120 = arith.divf %118, %119 : vector<8x128xf32>
    %121 = vector.extract_strided_slice %108 {offsets = [0, 256], sizes = [8, 128], strides = [1, 1]} : vector<8x512xf32> to vector<8x128xf32>
    %122 = arith.negf %121 : vector<8x128xf32>
    %123 = math.exp %122 : vector<8x128xf32>
    %cst_33 = arith.constant 1.000000e+00 : f32
    %124 = vector.broadcast %cst_33 : f32 to vector<8x128xf32>
    %125 = arith.addf %124, %123 : vector<8x128xf32>
    %126 = arith.divf %124, %125 : vector<8x128xf32>
    %127 = vector.extract_strided_slice %108 {offsets = [0, 384], sizes = [8, 128], strides = [1, 1]} : vector<8x512xf32> to vector<8x128xf32>
    %128 = math.tanh %127 : vector<8x128xf32>
    %129 = arith.mulf %114, %100 : vector<8x128xf32>
    %130 = arith.mulf %120, %128 : vector<8x128xf32>
    %131 = arith.addf %129, %130 : vector<8x128xf32>
    %132 = math.tanh %131 : vector<8x128xf32>
    %133 = arith.mulf %126, %132 : vector<8x128xf32>
    %c4_i32 = arith.constant 4 : i32
    %c8_i32_34 = arith.constant 8 : i32
    %134 = arith.muli %c4_i32, %c8_i32_34 : i32
    %135 = tpu.assume_multiple %134, 8 : i32
    %136 = arith.index_cast %135 : i32 to index
    %c0_35 = arith.constant 0 : index
    %137 = vector.load %arg8[%136, %c0_35] : memref<64x512xf32, #tpu.memory_space<vmem>>, vector<8x512xf32>
    %cst_36 = arith.constant dense<0.000000e+00> : vector<8x512xf32>
    %138 = tpu.matmul %133, %7, %cst_36 {dimension_numbers = #tpu.dot_dimension_numbers<[1], [0], [0], [1], [0, 0, 1, 1], [], []>} : vector<8x128xf32>, vector<128x512xf32>, vector<8x512xf32> -> vector<8x512xf32>
    %139 = arith.addf %137, %138 : vector<8x512xf32>
    %140 = vector.extract_strided_slice %139 {offsets = [0, 0], sizes = [8, 128], strides = [1, 1]} : vector<8x512xf32> to vector<8x128xf32>
    %141 = arith.negf %140 : vector<8x128xf32>
    %142 = math.exp %141 : vector<8x128xf32>
    %cst_37 = arith.constant 1.000000e+00 : f32
    %143 = vector.broadcast %cst_37 : f32 to vector<8x128xf32>
    %144 = arith.addf %143, %142 : vector<8x128xf32>
    %145 = arith.divf %143, %144 : vector<8x128xf32>
    %146 = vector.extract_strided_slice %139 {offsets = [0, 128], sizes = [8, 128], strides = [1, 1]} : vector<8x512xf32> to vector<8x128xf32>
    %147 = arith.negf %146 : vector<8x128xf32>
    %148 = math.exp %147 : vector<8x128xf32>
    %cst_38 = arith.constant 1.000000e+00 : f32
    %149 = vector.broadcast %cst_38 : f32 to vector<8x128xf32>
    %150 = arith.addf %149, %148 : vector<8x128xf32>
    %151 = arith.divf %149, %150 : vector<8x128xf32>
    %152 = vector.extract_strided_slice %139 {offsets = [0, 256], sizes = [8, 128], strides = [1, 1]} : vector<8x512xf32> to vector<8x128xf32>
    %153 = arith.negf %152 : vector<8x128xf32>
    %154 = math.exp %153 : vector<8x128xf32>
    %cst_39 = arith.constant 1.000000e+00 : f32
    %155 = vector.broadcast %cst_39 : f32 to vector<8x128xf32>
    %156 = arith.addf %155, %154 : vector<8x128xf32>
    %157 = arith.divf %155, %156 : vector<8x128xf32>
    %158 = vector.extract_strided_slice %139 {offsets = [0, 384], sizes = [8, 128], strides = [1, 1]} : vector<8x512xf32> to vector<8x128xf32>
    %159 = math.tanh %158 : vector<8x128xf32>
    %160 = arith.mulf %145, %131 : vector<8x128xf32>
    %161 = arith.mulf %151, %159 : vector<8x128xf32>
    %162 = arith.addf %160, %161 : vector<8x128xf32>
    %163 = math.tanh %162 : vector<8x128xf32>
    %164 = arith.mulf %157, %163 : vector<8x128xf32>
    %c5_i32 = arith.constant 5 : i32
    %c8_i32_40 = arith.constant 8 : i32
    %165 = arith.muli %c5_i32, %c8_i32_40 : i32
    %166 = tpu.assume_multiple %165, 8 : i32
    %167 = arith.index_cast %166 : i32 to index
    %c0_41 = arith.constant 0 : index
    %168 = vector.load %arg8[%167, %c0_41] : memref<64x512xf32, #tpu.memory_space<vmem>>, vector<8x512xf32>
    %cst_42 = arith.constant dense<0.000000e+00> : vector<8x512xf32>
    %169 = tpu.matmul %164, %7, %cst_42 {dimension_numbers = #tpu.dot_dimension_numbers<[1], [0], [0], [1], [0, 0, 1, 1], [], []>} : vector<8x128xf32>, vector<128x512xf32>, vector<8x512xf32> -> vector<8x512xf32>
    %170 = arith.addf %168, %169 : vector<8x512xf32>
    %171 = vector.extract_strided_slice %170 {offsets = [0, 0], sizes = [8, 128], strides = [1, 1]} : vector<8x512xf32> to vector<8x128xf32>
    %172 = arith.negf %171 : vector<8x128xf32>
    %173 = math.exp %172 : vector<8x128xf32>
    %cst_43 = arith.constant 1.000000e+00 : f32
    %174 = vector.broadcast %cst_43 : f32 to vector<8x128xf32>
    %175 = arith.addf %174, %173 : vector<8x128xf32>
    %176 = arith.divf %174, %175 : vector<8x128xf32>
    %177 = vector.extract_strided_slice %170 {offsets = [0, 128], sizes = [8, 128], strides = [1, 1]} : vector<8x512xf32> to vector<8x128xf32>
    %178 = arith.negf %177 : vector<8x128xf32>
    %179 = math.exp %178 : vector<8x128xf32>
    %cst_44 = arith.constant 1.000000e+00 : f32
    %180 = vector.broadcast %cst_44 : f32 to vector<8x128xf32>
    %181 = arith.addf %180, %179 : vector<8x128xf32>
    %182 = arith.divf %180, %181 : vector<8x128xf32>
    %183 = vector.extract_strided_slice %170 {offsets = [0, 256], sizes = [8, 128], strides = [1, 1]} : vector<8x512xf32> to vector<8x128xf32>
    %184 = arith.negf %183 : vector<8x128xf32>
    %185 = math.exp %184 : vector<8x128xf32>
    %cst_45 = arith.constant 1.000000e+00 : f32
    %186 = vector.broadcast %cst_45 : f32 to vector<8x128xf32>
    %187 = arith.addf %186, %185 : vector<8x128xf32>
    %188 = arith.divf %186, %187 : vector<8x128xf32>
    %189 = vector.extract_strided_slice %170 {offsets = [0, 384], sizes = [8, 128], strides = [1, 1]} : vector<8x512xf32> to vector<8x128xf32>
    %190 = math.tanh %189 : vector<8x128xf32>
    %191 = arith.mulf %176, %162 : vector<8x128xf32>
    %192 = arith.mulf %182, %190 : vector<8x128xf32>
    %193 = arith.addf %191, %192 : vector<8x128xf32>
    %194 = math.tanh %193 : vector<8x128xf32>
    %195 = arith.mulf %188, %194 : vector<8x128xf32>
    %c6_i32 = arith.constant 6 : i32
    %c8_i32_46 = arith.constant 8 : i32
    %196 = arith.muli %c6_i32, %c8_i32_46 : i32
    %197 = tpu.assume_multiple %196, 8 : i32
    %198 = arith.index_cast %197 : i32 to index
    %c0_47 = arith.constant 0 : index
    %199 = vector.load %arg8[%198, %c0_47] : memref<64x512xf32, #tpu.memory_space<vmem>>, vector<8x512xf32>
    %cst_48 = arith.constant dense<0.000000e+00> : vector<8x512xf32>
    %200 = tpu.matmul %195, %7, %cst_48 {dimension_numbers = #tpu.dot_dimension_numbers<[1], [0], [0], [1], [0, 0, 1, 1], [], []>} : vector<8x128xf32>, vector<128x512xf32>, vector<8x512xf32> -> vector<8x512xf32>
    %201 = arith.addf %199, %200 : vector<8x512xf32>
    %202 = vector.extract_strided_slice %201 {offsets = [0, 0], sizes = [8, 128], strides = [1, 1]} : vector<8x512xf32> to vector<8x128xf32>
    %203 = arith.negf %202 : vector<8x128xf32>
    %204 = math.exp %203 : vector<8x128xf32>
    %cst_49 = arith.constant 1.000000e+00 : f32
    %205 = vector.broadcast %cst_49 : f32 to vector<8x128xf32>
    %206 = arith.addf %205, %204 : vector<8x128xf32>
    %207 = arith.divf %205, %206 : vector<8x128xf32>
    %208 = vector.extract_strided_slice %201 {offsets = [0, 128], sizes = [8, 128], strides = [1, 1]} : vector<8x512xf32> to vector<8x128xf32>
    %209 = arith.negf %208 : vector<8x128xf32>
    %210 = math.exp %209 : vector<8x128xf32>
    %cst_50 = arith.constant 1.000000e+00 : f32
    %211 = vector.broadcast %cst_50 : f32 to vector<8x128xf32>
    %212 = arith.addf %211, %210 : vector<8x128xf32>
    %213 = arith.divf %211, %212 : vector<8x128xf32>
    %214 = vector.extract_strided_slice %201 {offsets = [0, 256], sizes = [8, 128], strides = [1, 1]} : vector<8x512xf32> to vector<8x128xf32>
    %215 = arith.negf %214 : vector<8x128xf32>
    %216 = math.exp %215 : vector<8x128xf32>
    %cst_51 = arith.constant 1.000000e+00 : f32
    %217 = vector.broadcast %cst_51 : f32 to vector<8x128xf32>
    %218 = arith.addf %217, %216 : vector<8x128xf32>
    %219 = arith.divf %217, %218 : vector<8x128xf32>
    %220 = vector.extract_strided_slice %201 {offsets = [0, 384], sizes = [8, 128], strides = [1, 1]} : vector<8x512xf32> to vector<8x128xf32>
    %221 = math.tanh %220 : vector<8x128xf32>
    %222 = arith.mulf %207, %193 : vector<8x128xf32>
    %223 = arith.mulf %213, %221 : vector<8x128xf32>
    %224 = arith.addf %222, %223 : vector<8x128xf32>
    %225 = math.tanh %224 : vector<8x128xf32>
    %226 = arith.mulf %219, %225 : vector<8x128xf32>
    %c7_i32 = arith.constant 7 : i32
    %c8_i32_52 = arith.constant 8 : i32
    %227 = arith.muli %c7_i32, %c8_i32_52 : i32
    %228 = tpu.assume_multiple %227, 8 : i32
    %229 = arith.index_cast %228 : i32 to index
    %c0_53 = arith.constant 0 : index
    %230 = vector.load %arg8[%229, %c0_53] : memref<64x512xf32, #tpu.memory_space<vmem>>, vector<8x512xf32>
    %cst_54 = arith.constant dense<0.000000e+00> : vector<8x512xf32>
    %231 = tpu.matmul %226, %7, %cst_54 {dimension_numbers = #tpu.dot_dimension_numbers<[1], [0], [0], [1], [0, 0, 1, 1], [], []>} : vector<8x128xf32>, vector<128x512xf32>, vector<8x512xf32> -> vector<8x512xf32>
    %232 = arith.addf %230, %231 : vector<8x512xf32>
    %233 = vector.extract_strided_slice %232 {offsets = [0, 0], sizes = [8, 128], strides = [1, 1]} : vector<8x512xf32> to vector<8x128xf32>
    %234 = arith.negf %233 : vector<8x128xf32>
    %235 = math.exp %234 : vector<8x128xf32>
    %cst_55 = arith.constant 1.000000e+00 : f32
    %236 = vector.broadcast %cst_55 : f32 to vector<8x128xf32>
    %237 = arith.addf %236, %235 : vector<8x128xf32>
    %238 = arith.divf %236, %237 : vector<8x128xf32>
    %239 = vector.extract_strided_slice %232 {offsets = [0, 128], sizes = [8, 128], strides = [1, 1]} : vector<8x512xf32> to vector<8x128xf32>
    %240 = arith.negf %239 : vector<8x128xf32>
    %241 = math.exp %240 : vector<8x128xf32>
    %cst_56 = arith.constant 1.000000e+00 : f32
    %242 = vector.broadcast %cst_56 : f32 to vector<8x128xf32>
    %243 = arith.addf %242, %241 : vector<8x128xf32>
    %244 = arith.divf %242, %243 : vector<8x128xf32>
    %245 = vector.extract_strided_slice %232 {offsets = [0, 256], sizes = [8, 128], strides = [1, 1]} : vector<8x512xf32> to vector<8x128xf32>
    %246 = arith.negf %245 : vector<8x128xf32>
    %247 = math.exp %246 : vector<8x128xf32>
    %cst_57 = arith.constant 1.000000e+00 : f32
    %248 = vector.broadcast %cst_57 : f32 to vector<8x128xf32>
    %249 = arith.addf %248, %247 : vector<8x128xf32>
    %250 = arith.divf %248, %249 : vector<8x128xf32>
    %251 = vector.extract_strided_slice %232 {offsets = [0, 384], sizes = [8, 128], strides = [1, 1]} : vector<8x512xf32> to vector<8x128xf32>
    %252 = math.tanh %251 : vector<8x128xf32>
    %253 = arith.mulf %238, %224 : vector<8x128xf32>
    %254 = arith.mulf %244, %252 : vector<8x128xf32>
    %255 = arith.addf %253, %254 : vector<8x128xf32>
    %256 = math.tanh %255 : vector<8x128xf32>
    %257 = arith.mulf %250, %256 : vector<8x128xf32>
    %c8_i32_58 = arith.constant 8 : i32
    %c0_59 = arith.constant 0 : index
    %c0_60 = arith.constant 0 : index
    %258 = vector.load %arg5[%c0_59, %c0_60] : memref<128x128xf32, #tpu.memory_space<vmem>>, vector<128x128xf32>
    %cst_61 = arith.constant dense<0.000000e+00> : vector<8x128xf32>
    %259 = tpu.matmul %257, %258, %cst_61 {dimension_numbers = #tpu.dot_dimension_numbers<[1], [0], [0], [1], [0, 0, 1, 1], [], []>} : vector<8x128xf32>, vector<128x128xf32>, vector<8x128xf32> -> vector<8x128xf32>
    %c0_62 = arith.constant 0 : index
    %c0_63 = arith.constant 0 : index
    %260 = vector.load %arg6[%c0_62, %c0_63] : memref<1x128xf32, #tpu.memory_space<vmem>>, vector<1x128xf32>
    %261 = vector.broadcast %260 : vector<1x128xf32> to vector<8x128xf32>
    %262 = arith.addf %259, %261 : vector<8x128xf32>
    %c0_64 = arith.constant 0 : index
    %c0_65 = arith.constant 0 : index
    %263 = vector.load %arg7[%c0_64, %c0_65] : memref<8x128xf32, #tpu.memory_space<vmem>>, vector<8x128xf32>
    tpu.vector_store %arg7[%c0_64, %c0_65], %262 {strides = array<i32>} : memref<8x128xf32, #tpu.memory_space<vmem>>, vector<8x128xf32>,
    return
  }
  func.func @transform_0(%arg0: i32) -> (i32, i32) {
    %c0_i32 = arith.constant 0 : i32
    %c0_i32_0 = arith.constant 0 : i32
    %c0_i32_1 = arith.constant 0 : i32
    return %c0_i32, %c0_i32_0 : i32, i32
  }
  func.func @transform_1(%arg0: i32) -> (i32, i32) {
    %c0_i32 = arith.constant 0 : i32
    %c0_i32_0 = arith.constant 0 : i32
    %c0_i32_1 = arith.constant 0 : i32
    return %c0_i32, %c0_i32_0 : i32, i32
  }
  func.func @transform_2(%arg0: i32) -> (i32, i32) {
    %c0_i32 = arith.constant 0 : i32
    %c0_i32_0 = arith.constant 0 : i32
    %c0_i32_1 = arith.constant 0 : i32
    return %c0_i32, %c0_i32_0 : i32, i32
  }
  func.func @transform_3(%arg0: i32) -> (i32, i32) {
    %c0_i32 = arith.constant 0 : i32
    %c0_i32_0 = arith.constant 0 : i32
    %c0_i32_1 = arith.constant 0 : i32
    return %c0_i32, %c0_i32_0 : i32, i32
  }
  func.func @transform_4(%arg0: i32) -> (i32, i32) {
    %c0_i32 = arith.constant 0 : i32
    %c0_i32_0 = arith.constant 0 : i32
    %c0_i32_1 = arith.constant 0 : i32
    return %c0_i32, %c0_i32_0 : i32, i32
  }
  func.func @transform_5(%arg0: i32) -> (i32, i32) {
    %c0_i32 = arith.constant 0 : i32
    %c0_i32_0 = arith.constant 0 : i32
    %c0_i32_1 = arith.constant 0 : i32
    return %c0_i32, %c0_i32_0 : i32, i32
  }
  func.func @transform_6(%arg0: i32) -> (i32, i32) {
    %c0_i32 = arith.constant 0 : i32
    %c0_i32_0 = arith.constant 0 : i32
    %c0_i32_1 = arith.constant 0 : i32
    return %c0_i32, %c0_i32_0 : i32, i32
  }
}

</mosaic_0001>

<bundles_post_ra>
// kernel: tpu_custom_call.1
= control target key start
LH: loop header
LB: loop body
LE: loop exit
PB: predicated region body
PF: predicated region fallthrough
CT: control target
= control target key end

     0   :  { %11 = vsyncpa [#allocation4], 0  ;;  %s3503_s0 = inlined_call_operand.vmem [shape: f32[64,32], index: 0, kind: input, shape index: {}]   ;;  %s3504_s1 = inlined_call_operand.hbm [shape: f32[32,512], index: 1, kind: input, shape index: {}]   ;;  %s3505_s2 = inlined_call_operand.vmem [shape: f32[1,512], index: 2, kind: input, shape index: {}]   ;;  %s3506_s3 = inlined_call_operand.hbm [shape: f32[128,512], index: 3, kind: input, shape index: {}]   ;;  %s3507_s4 = inlined_call_operand.hbm [shape: f32[128,128], index: 4, kind: input, shape index: {}]   ;;  %s3508_s5 = inlined_call_operand.vmem [shape: f32[1,128], index: 5, kind: input, shape index: {}]   ;;  %s3509_s6 = inlined_call_operand.hbm [shape: f32[8,128], index: 6, kind: output, shape index: {}]  }
   0x1   :  { %12 = vsyncpa [#allocation7], 0 }
   0x2   :  { %13 = vsyncpa [#allocation5], 0  ;;  %s2933_s21 = smov [#allocation6]   ;;  %s2934_s23 = smov [#allocation3]  }
   0x3   :  { %s35_s22 = sshll.u32 %s2933_s21, 4  ;;  %s21_s24 = sshll.u32 %s2934_s23, 4  ;;  %s36_s22 = int_to_ptr.vmem [resolvable:$true] %s35_s22  ;;  %s2979_s24 = int_to_ptr.vmem [resolvable:$true] %s21_s24 }
   0x4   :  { %s2839_s27 = scalar_lea.hbm %s3506_s3, 8192 }
   0x5   :  { %p2840_p0 = scmp.ne.s32.totalorder %s3506_s3, %s2839_s27  ;;  %p2843_p1 = scmp.lt.u32.totalorder %s2839_s27, %s3506_s3 }
   0x7   :  { %p2845_p2 = pnand %p2843_p1, %p2840_p0 }
   0x9   :  { %2848 = shalt.err (!%p2845_p2)
}
   0xa   :  { %s2849_s8 = scalar_lea.vmem %s36_s22, 8192  ;;  %p2854_p4 = scmp.lt.s32.totalorder %s36_s22, %s36_s22 }
   0xb   :  { %p2850_p3 = scmp.ne.s32.totalorder %s36_s22, %s2849_s8  ;;  %p2855_p5 = scmp.lt.s32.totalorder %s2849_s8, %s2849_s8 }
   0xd   :  { %p2856_p6 = por %p2855_p5, %p2854_p4 }
   0xf   :  { %p2857_p7 = pnand %p2856_p6, %p2850_p3 }
  0x11   :  { %2860 = shalt.err (!%p2857_p7)
}
  0x12   :  { %s2935_s9 = smov 512   ;;  %s2936_s10 = smov 32  }
  0x13   :  { %41 = dma.hbm_to_vmem [thread:$0]  %s3506_s3, 8192, %s36_s22, [#allocation7], %s2935_s9, %s2935_s9, %s2936_s10  }
  0x14   :  { %s2861_s15 = scalar_lea.hbm %s3504_s1, 2048 }
  0x15   :  { %p2862_p8 = scmp.ne.s32.totalorder %s3504_s1, %s2861_s15  ;;  %p2865_p9 = scmp.lt.u32.totalorder %s2861_s15, %s3504_s1 }
  0x17   :  { %p2867_p10 = pnand %p2865_p9, %p2862_p8 }
  0x19   :  { %2870 = shalt.err (!%p2867_p10)
}
  0x1a   :  { %s2871_s20 = scalar_lea.vmem %s2979_s24, 2048  ;;  %p2876_p12 = scmp.lt.s32.totalorder %s2979_s24, %s2979_s24 }
  0x1b   :  { %p2872_p11 = scmp.ne.s32.totalorder %s2979_s24, %s2871_s20  ;;  %p2877_p13 = scmp.lt.s32.totalorder %s2871_s20, %s2871_s20 }
  0x1d   :  { %p2878_p0 = por %p2877_p13, %p2876_p12 }
  0x1f   :  { %p2879_p1 = pnand %p2878_p0, %p2872_p11 }
  0x21   :  { %2882 = shalt.err (!%p2879_p1)
}
  0x22   :  { %27 = dma.hbm_to_vmem [thread:$0]  %s3504_s1, 2048, %s2979_s24, [#allocation4], %s2935_s9, %s2935_s9, %s2936_s10  }
  0x23   :  { %s2937_s22 = smov [#allocation8]   ;;  %s2883_s27 = scalar_lea.hbm %s3507_s4, 2048 }
  0x24   :  { %s47_s23 = sshll.u32 %s2937_s22, 4  ;;  %p2884_p2 = scmp.ne.s32.totalorder %s3507_s4, %s2883_s27  ;;  %s48_s23 = int_to_ptr.vmem [resolvable:$true] %s47_s23 }
  0x25   :  { %p2887_p3 = scmp.lt.u32.totalorder %s2883_s27, %s3507_s4 }
  0x27   :  { %p2889_p4 = pnand %p2887_p3, %p2884_p2 }
  0x29   :  { %2892 = shalt.err (!%p2889_p4)
}
  0x2a   :  { %s2893_s8 = scalar_lea.vmem %s48_s23, 2048  ;;  %p2898_p6 = scmp.lt.s32.totalorder %s48_s23, %s48_s23 }
  0x2b   :  { %p2894_p5 = scmp.ne.s32.totalorder %s48_s23, %s2893_s8  ;;  %p2899_p7 = scmp.lt.s32.totalorder %s2893_s8, %s2893_s8 }
  0x2d   :  { %p2900_p8 = por %p2899_p7, %p2898_p6 }
  0x2f   :  { %p2901_p9 = pnand %p2900_p8, %p2894_p5 }
  0x31   :  { %2904 = shalt.err (!%p2901_p9)
}
  0x32   :  { %s2938_s1 = smov 128   ;;  %s2939_s24 = smov 8  }
  0x33   :  { %53 = dma.hbm_to_vmem [thread:$0]  %s3507_s4, 2048, %s48_s23, [#allocation7], %s2938_s1, %s2938_s1, %s2939_s24  }
  0x34   :  { %2927 = dma.done.wait [#allocation4], 2048  }
  0x35   :  { %2928 = vsyncadd [#allocation4], 4294965248 }
  0x36   :  { %2929 = dma.done.wait [#allocation7], 10240  }
  0x37   :  { %2930 = vsyncadd [#allocation7], 4294957056  ;;  %v2940_v0 = vmov 0.0   ;;  %v74_v1 = vld [vmem:[#allocation3 + $0x8] sm:$0xff]  ;;  %v76_v3 = vld [vmem:[#allocation3 + $0x18] sm:$0xff]  ;;  %vm111_vm0 = vcmask 261120  }
  0x38   :  { %200 = vmatprep.mubr.f32.mxu0 %v2940_v0  ;;  %313 = vmatprep.mubr.f32.mxu1 %v2940_v0  ;;  %v78_v2 = vld [vmem:[#allocation3 + $0x28] sm:$0xff]  ;;  %v80_v5 = vld [vmem:[#allocation3 + $0x38] sm:$0xff]  ;;  %v73_v6 = vld [vmem:[#allocation3] sm:$0xff]  ;;  %vm2942_vm1 = vmmov 0   ;;  %s2943_s28 = smov [#allocation9]  }
  0x39   :  { %v2084_v4 = vpack.c.bf16 %v78_v2, %v74_v1  ;;  %v77_v7 = vld [vmem:[#allocation3 + $0x20] sm:$0xff]  ;;  %v2092_v8 = vpack.c.bf16 %v80_v5, %v76_v3  ;;  %v75_v10 = vld [vmem:[#allocation3 + $0x10] sm:$0xff]  ;;  %v82_v12 = vld [vmem:[#allocation3 + $0x48] sm:$0xff]  ;;  %s1974_s29 = sshll.u32 %s2943_s28, 4  ;;  %s1975_s29 = int_to_ptr.vmem [resolvable:$true] %s1974_s29 }
  0x3a   :  { %v2086_v9 = vpack.c.bf16 %v77_v7, %v73_v6  ;;  %v79_v11 = vld [vmem:[#allocation3 + $0x30] sm:$0xff]  ;;  %v86_v14 = vld [vmem:[#allocation3 + $0x68] sm:$0xff]  ;;  %v84_v15 = vld [vmem:[#allocation3 + $0x58] sm:$0xff]  ;;  %s2905_s30 = scalar_lea.vmem %s1975_s29, 128  ;;  %p2910_p11 = scmp.lt.s32.totalorder %s1975_s29, %s1975_s29 }
  0x3b   :  { %2085 = vmatprep.subr.bf16.mxu0 %v2084_v4  ;;  %v2094_v13 = vpack.c.bf16 %v79_v11, %v75_v10  ;;  %v88_v16 = vld [vmem:[#allocation3 + $0x78] sm:$0xff]  ;;  %2093 = vmatprep.subr.bf16.mxu1 %v2092_v8  ;;  %v2088_v17 = vpack.c.bf16 %v86_v14, %v82_v12  ;;  %v81_v19 = vld [vmem:[#allocation3 + $0x40] sm:$0xff]  ;;  %v83_v21 = vld [vmem:[#allocation3 + $0x50] sm:$0xff]  ;;  %p2906_p10 = scmp.ne.s32.totalorder %s1975_s29, %s2905_s30  ;;  %p2911_p12 = scmp.lt.s32.totalorder %s2905_s30, %s2905_s30 }
  0x3c   :  { %2087 = vmatpush1.bf16.msra.mxu0 %v2086_v9  ;;  %v2096_v18 = vpack.c.bf16 %v88_v16, %v84_v15  ;;  %v85_v20 = vld [vmem:[#allocation3 + $0x60] sm:$0xff]  ;;  %v87_v23 = vld [vmem:[#allocation3 + $0x70] sm:$0xff]  ;;  %v395_v24 = vld [vmem:[#allocation6 + $0x8] sm:$0xff] }
  0x3d   :  { %2095 = vmatpush1.bf16.msra.mxu1 %v2094_v13  ;;  %v2090_v22 = vpack.c.bf16 %v85_v20, %v81_v19  ;;  %2089 = vmatprep.subr.bf16.mxu0 %v2088_v17  ;;  %v2098_v25 = vpack.c.bf16 %v87_v23, %v83_v21  ;;  %v399_v26 = vld [vmem:[#allocation6 + $0x28] sm:$0xff]  ;;  %v397_v27 = vld [vmem:[#allocation6 + $0x18] sm:$0xff]  ;;  %v394_v31 = vld [vmem:[#allocation6] sm:$0xff]  ;;  %p2912_p13 = por %p2911_p12, %p2910_p11 }
  0x3e   :  { %2097 = vmatprep.subr.bf16.mxu1 %v2096_v18  ;;  %v401_v28 = vld [vmem:[#allocation6 + $0x38] sm:$0xff]  ;;  %v3024_v29 = vpack.c.bf16 %v399_v26, %v395_v24  ;;  %v398_v32 = vld [vmem:[#allocation6 + $0x20] sm:$0xff]  ;;  %v396_v33 = vld [vmem:[#allocation6 + $0x10] sm:$0xff] }
  0x3f   :  { %v3026_v30 = vpack.c.bf16 %v401_v28, %v397_v27  ;;  %v65_v34 = vld [vmem:[%s3503_s0] sm:$0xff]  ;;  %v3031_v35 = vpack.c.bf16 %v398_v32, %v394_v31  ;;  %v400_v36 = vld [vmem:[#allocation6 + $0x30] sm:$0xff]  ;;  %v403_v37 = vld [vmem:[#allocation6 + $0x48] sm:$0xff]  ;;  %p2913_p0 = pnand %p2912_p13, %p2906_p10 }
  0x40   :  { %2091 = vmatpush1.bf16.msra.mxu0 %v2090_v22  ;;  %v3034_v38 = vpack.c.bf16 %v400_v36, %v396_v33  ;;  %v407_v39 = vld [vmem:[#allocation6 + $0x68] sm:$0xff]  ;;  %v405_v40 = vld [vmem:[#allocation6 + $0x58] sm:$0xff]  ;;  %v402_v43 = vld [vmem:[#allocation6 + $0x40] sm:$0xff] }
  0x41   :  { %2099 = vmatpush1.bf16.msra.mxu1 %v2098_v25  ;;  %2101 = vmatprep.subr.bf16.mxu0 %v3024_v29  ;;  %v409_v41 = vld [vmem:[#allocation6 + $0x78] sm:$0xff]  ;;  %v3037_v42 = vpack.c.bf16 %v407_v39, %v403_v37  ;;  %v406_v44 = vld [vmem:[#allocation6 + $0x60] sm:$0xff]  ;;  %v404_v45 = vld [vmem:[#allocation6 + $0x50] sm:$0xff] }
  0x42   :  { %2133 = vmatprep.subr.bf16.mxu1 %v3026_v30  ;;  %v66_v46 = vld [vmem:[%s3503_s0 + $0x8] sm:$0xff]  ;;  %v3043_v47 = vpack.c.bf16 %v409_v41, %v405_v40  ;;  %v408_v48 = vld [vmem:[#allocation6 + $0x70] sm:$0xff]  ;;  %v3047_v50 = vpack.c.bf16 %v406_v44, %v402_v43  ;;  %v413_v52 = vld [vmem:[#allocation6 + $0x98] sm:$0xff] }
  0x43   :  { %1991 = vmatmul.mubr.msk.f32.vlgmr.msra.gmra.mrb[0].mxu0 %vm111_vm0, %v65_v34  ;;  %v411_v49 = vld [vmem:[#allocation6 + $0x88] sm:$0xff]  ;;  %v417_v53 = vld [vmem:[#allocation6 + $0xb8] sm:$0xff]  ;;  %v3051_v54 = vpack.c.bf16 %v408_v48, %v404_v45  ;;  %v410_v55 = vld [vmem:[#allocation6 + $0x80] sm:$0xff] }
  0x44   :  { %1999 = vmatmul.mubr.msk.f32.vlgmr.msra.gmra.mrb[0].mxu1 %vm111_vm0, %v65_v34  ;;  %2103 = vmatpush1.bf16.msra.mxu0 %v3031_v35  ;;  %v415_v51 = vld [vmem:[#allocation6 + $0xa8] sm:$0xff]  ;;  %v414_v56 = vld [vmem:[#allocation6 + $0xa0] sm:$0xff]  ;;  %v412_v58 = vld [vmem:[#allocation6 + $0x90] sm:$0xff]  ;;  %v3059_v60 = vpack.c.bf16 %v417_v53, %v413_v52 }
  0x45   :  { %2135 = vmatpush1.bf16.msra.mxu1 %v3034_v38  ;;  %206 = vmatprep.mubr.f32.mxu0 %v2940_v0  ;;  %v3055_v57 = vpack.c.bf16 %v415_v51, %v411_v49  ;;  %v416_v59 = vld [vmem:[#allocation6 + $0xb0] sm:$0xff]  ;;  %v419_v61 = vld [vmem:[#allocation6 + $0xc8] sm:$0xff]  ;;  %v3066_v1 = vpack.c.bf16 %v414_v56, %v410_v55  ;;  %v421_v2 = vld [vmem:[#allocation6 + $0xd8] sm:$0xff] }
  0x46   :  { %319 = vmatprep.mubr.f32.mxu1 %v2940_v0  ;;  %2105 = vmatprep.subr.bf16.mxu0 %v3037_v42  ;;  %v423_v62 = vld [vmem:[#allocation6 + $0xe8] sm:$0xff]  ;;  %v67_v63 = vld [vmem:[%s3503_s0 + $0x10] sm:$0xff]  ;;  %v425_v3 = vld [vmem:[#allocation6 + $0xf8] sm:$0xff]  ;;  %v3070_v4 = vpack.c.bf16 %v416_v59, %v412_v58 }
  0x47   :  { %1992 = vmatmul.mubr.msk.f32.gmra.mrb[2].mxu0 %vm111_vm0, %v66_v46  ;;  %2137 = vmatprep.subr.bf16.mxu1 %v3043_v47  ;;  %v418_v5 = vld [vmem:[#allocation6 + $0xc0] sm:$0xff]  ;;  %v3074_v7 = vpack.c.bf16 %v423_v62, %v419_v61  ;;  %v420_v8 = vld [vmem:[#allocation6 + $0xd0] sm:$0xff]  ;;  %v3078_v10 = vpack.c.bf16 %v425_v3, %v421_v2  ;;  %v427_v11 = vld [vmem:[#allocation6 + $0x108] sm:$0xff] }
  0x48   :  { %2000 = vmatmul.mubr.msk.f32.gmra.mrb[2].mxu1 %vm111_vm0, %v66_v46  ;;  %2107 = vmatpush1.bf16.msra.mxu0 %v3047_v50  ;;  %v422_v6 = vld [vmem:[#allocation6 + $0xe0] sm:$0xff]  ;;  %v424_v9 = vld [vmem:[#allocation6 + $0xf0] sm:$0xff]  ;;  %v431_v12 = vld [vmem:[#allocation6 + $0x128] sm:$0xff] }
  0x49   :  { %2139 = vmatpush1.bf16.msra.mxu1 %v3051_v54  ;;  %212 = vmatprep.mubr.f32.mxu0 %v2940_v0  ;;  %v68_v13 = vld [vmem:[%s3503_s0 + $0x18] sm:$0xff]  ;;  %v3085_v14 = vpack.c.bf16 %v422_v6, %v418_v5  ;;  %v3089_v17 = vpack.c.bf16 %v424_v9, %v420_v8  ;;  %v426_v18 = vld [vmem:[#allocation6 + $0x100] sm:$0xff]  ;;  %v3093_v20 = vpack.c.bf16 %v431_v12, %v427_v11  ;;  %v428_v21 = vld [vmem:[#allocation6 + $0x110] sm:$0xff] }
  0x4a   :  { %325 = vmatprep.mubr.f32.mxu1 %v2940_v0  ;;  %2109 = vmatprep.subr.bf16.mxu0 %v3055_v57  ;;  %v429_v15 = vld [vmem:[#allocation6 + $0x118] sm:$0xff]  ;;  %v430_v19 = vld [vmem:[#allocation6 + $0x120] sm:$0xff]  ;;  %v432_v22 = vld [vmem:[#allocation6 + $0x130] sm:$0xff] }
  0x4b   :  { %1993 = vmatmul.mubr.msk.f32.gmra.mrb[4].mxu0 %vm111_vm0, %v67_v63  ;;  %2141 = vmatprep.subr.bf16.mxu1 %v3059_v60  ;;  %v433_v16 = vld [vmem:[#allocation6 + $0x138] sm:$0xff]  ;;  %v435_v24 = vld [vmem:[#allocation6 + $0x148] sm:$0xff]  ;;  %v69_v26 = vld [vmem:[%s3503_s0 + $0x20] sm:$0xff]  ;;  %v3104_v27 = vpack.c.bf16 %v430_v19, %v426_v18  ;;  %v3108_v32 = vpack.c.bf16 %v432_v22, %v428_v21  ;;  %v91_v19 = vlaneseq }
  0x4c   :  { %2001 = vmatmul.mubr.msk.f32.gmra.mrb[4].mxu1 %vm111_vm0, %v67_v63  ;;  %2111 = vmatpush1.bf16.msra.mxu0 %v3066_v1  ;;  %v3097_v23 = vpack.c.bf16 %v433_v16, %v429_v15  ;;  %v439_v25 = vld [vmem:[#allocation6 + $0x168] sm:$0xff]  ;;  %v437_v28 = vld [vmem:[#allocation6 + $0x158] sm:$0xff]  ;;  %v434_v33 = vld [vmem:[#allocation6 + $0x140] sm:$0xff] }
  0x4d   :  { %2143 = vmatpush1.bf16.msra.mxu1 %v3070_v4  ;;  %218 = vmatprep.mubr.f32.mxu0 %v2940_v0  ;;  %v441_v31 = vld [vmem:[#allocation6 + $0x178] sm:$0xff]  ;;  %v438_v34 = vld [vmem:[#allocation6 + $0x160] sm:$0xff]  ;;  %v3112_v36 = vpack.c.bf16 %v439_v25, %v435_v24  ;;  %v436_v37 = vld [vmem:[#allocation6 + $0x150] sm:$0xff]  ;;  %v92_v21 = vshrl.u32 %v91_v19, 7 }
  0x4e   :  { %331 = vmatprep.mubr.f32.mxu1 %v2940_v0  ;;  %2113 = vmatprep.subr.bf16.mxu0 %v3074_v7  ;;  %v440_v39 = vld [vmem:[#allocation6 + $0x170] sm:$0xff]  ;;  %v3116_v40 = vpack.c.bf16 %v441_v31, %v437_v28  ;;  %v443_v41 = vld [vmem:[#allocation6 + $0x188] sm:$0xff]  ;;  %v3123_v45 = vpack.c.bf16 %v438_v34, %v434_v33  ;;  %v445_v46 = vld [vmem:[#allocation6 + $0x198] sm:$0xff] }
  0x4f   :  { %1994 = vmatmul.mubr.msk.f32.gmra.mrb[6].mxu0 %vm111_vm0, %v68_v13  ;;  %2145 = vmatprep.subr.bf16.mxu1 %v3078_v10  ;;  %v447_v43 = vld [vmem:[#allocation6 + $0x1a8] sm:$0xff]  ;;  %v449_v48 = vld [vmem:[#allocation6 + $0x1b8] sm:$0xff]  ;;  %v3127_v49 = vpack.c.bf16 %v440_v39, %v436_v37  ;;  %v442_v51 = vld [vmem:[#allocation6 + $0x180] sm:$0xff]  ;;  %v93_v22 = vsub.s32 0, %v92_v21  ;;  %v97_v25 = vsub.s32 1, %v92_v21  ;;  %v101_v34 = vsub.s32 2, %v92_v21 }
  0x50   :  { %2002 = vmatmul.mubr.msk.f32.gmra.mrb[6].mxu1 %vm111_vm0, %v68_v13  ;;  %2115 = vmatpush1.bf16.msra.mxu0 %v3085_v14  ;;  %v70_v44 = vld [vmem:[%s3503_s0 + $0x28] sm:$0xff]  ;;  %v446_v52 = vld [vmem:[#allocation6 + $0x1a0] sm:$0xff]  ;;  %v3131_v53 = vpack.c.bf16 %v447_v43, %v443_v41  ;;  %v444_v55 = vld [vmem:[#allocation6 + $0x190] sm:$0xff]  ;;  %v3135_v58 = vpack.c.bf16 %v449_v48, %v445_v46 }
  0x51   :  { %2147 = vmatpush1.bf16.msra.mxu1 %v3089_v17  ;;  %224 = vmatprep.mubr.f32.mxu0 %v2940_v0  ;;  %v448_v56 = vld [vmem:[#allocation6 + $0x1b0] sm:$0xff]  ;;  %v451_v59 = vld [vmem:[#allocation6 + $0x1c8] sm:$0xff]  ;;  %v3142_v63 = vpack.c.bf16 %v446_v52, %v442_v51  ;;  %v453_v2 = vld [vmem:[#allocation6 + $0x1d8] sm:$0xff]  ;;  %v105_v51 = vsub.s32 3, %v92_v21 }
  0x52   :  { %337 = vmatprep.mubr.f32.mxu1 %v2940_v0  ;;  %2117 = vmatprep.subr.bf16.mxu0 %v3093_v20  ;;  %v455_v61 = vld [vmem:[#allocation6 + $0x1e8] sm:$0xff]  ;;  %v71_v62 = vld [vmem:[%s3503_s0 + $0x30] sm:$0xff]  ;;  %v457_v3 = vld [vmem:[#allocation6 + $0x1f8] sm:$0xff]  ;;  %v3146_v5 = vpack.c.bf16 %v448_v56, %v444_v55 }
  0x53   :  { %1995 = vmatmul.mubr.msk.f32.gmra.mrb[8].mxu0 %vm111_vm0, %v69_v26  ;;  %2149 = vmatprep.subr.bf16.mxu1 %v3097_v23  ;;  %v450_v6 = vld [vmem:[#allocation6 + $0x1c0] sm:$0xff]  ;;  %v3150_v9 = vpack.c.bf16 %v455_v61, %v451_v59  ;;  %v452_v11 = vld [vmem:[#allocation6 + $0x1d0] sm:$0xff]  ;;  %v3154_v13 = vpack.c.bf16 %v457_v3, %v453_v2  ;;  %v72_v15 = vld [vmem:[%s3503_s0 + $0x38] sm:$0xff] }
  0x54   :  { %2003 = vmatmul.mubr.msk.f32.gmra.mrb[8].mxu1 %vm111_vm0, %v69_v26  ;;  %2119 = vmatpush1.bf16.msra.mxu0 %v3104_v27  ;;  %v454_v8 = vld [vmem:[#allocation6 + $0x1e0] sm:$0xff]  ;;  %v456_v12 = vld [vmem:[#allocation6 + $0x1f0] sm:$0xff] }
  0x55   :  { %2151 = vmatpush1.bf16.msra.mxu1 %v3108_v32  ;;  %230 = vmatprep.mubr.f32.mxu0 %v2940_v0  ;;  %v3161_v16 = vpack.c.bf16 %v454_v8, %v450_v6  ;;  %v3165_v18 = vpack.c.bf16 %v456_v12, %v452_v11  ;;  %v89_v24 = vld [vmem:[%s3505_s2] sm:$0xf] }
  0x56   :  { %343 = vmatprep.mubr.f32.mxu1 %v2940_v0  ;;  %2121 = vmatprep.subr.bf16.mxu0 %v3112_v36  ;;  %v3217_v26 = vrot.slane %v89_v24, %v93_v22  ;;  %v3219_v28 = vrot.slane %v89_v24, %v97_v25  ;;  %v3223_v48 = vrot.slane %v89_v24, %v101_v34 }
  0x57   :  { %1996 = vmatmul.mubr.msk.f32.gmra.mrb[10].mxu0 %vm111_vm0, %v70_v44  ;;  %2153 = vmatprep.subr.bf16.mxu1 %v3116_v40  ;;  %v3226_v55 = vrot.slane %v89_v24, %v105_v51 }
  0x58   :  { %2004 = vmatmul.mubr.msk.f32.gmra.mrb[10].mxu1 %vm111_vm0, %v70_v44  ;;  %2123 = vmatpush1.bf16.msra.mxu0 %v3123_v45 }
  0x59   :  { %2155 = vmatpush1.bf16.msra.mxu1 %v3127_v49  ;;  %236 = vmatprep.mubr.f32.mxu0 %v2940_v0 }
  0x5a   :  { %349 = vmatprep.mubr.f32.mxu1 %v2940_v0  ;;  %2125 = vmatprep.subr.bf16.mxu0 %v3131_v53 }
  0x5b   :  { %1997 = vmatmul.mubr.msk.f32.gmra.mrb[12].mxu0 %vm111_vm0, %v71_v62  ;;  %2157 = vmatprep.subr.bf16.mxu1 %v3135_v58 }
  0x5c   :  { %2005 = vmatmul.mubr.msk.f32.gmra.mrb[12].mxu1 %vm111_vm0, %v71_v62  ;;  %2127 = vmatpush1.bf16.msra.mxu0 %v3142_v63 }
  0x5d   :  { %2159 = vmatpush1.bf16.msra.mxu1 %v3146_v5  ;;  %242 = vmatprep.mubr.f32.mxu0 %v2940_v0 }
  0x5e   :  { %355 = vmatprep.mubr.f32.mxu1 %v2940_v0  ;;  %2129 = vmatprep.subr.bf16.mxu0 %v3150_v9 }
  0x5f   :  { %1998 = vmatmul.mubr.msk.f32.gmra.mrb[14].mxu0 %vm111_vm0, %v72_v15  ;;  %2161 = vmatprep.subr.bf16.mxu1 %v3154_v13 }
  0x60   :  { %2006 = vmatmul.mubr.msk.f32.gmra.mrb[14].mxu1 %vm111_vm0, %v72_v15  ;;  %2131 = vmatpush1.bf16.msra.mxu0 %v3161_v16 }
  0x61   :  { %2163 = vmatpush1.bf16.msra.mxu1 %v3165_v18  ;;  %529 = vmatprep.mubr.f32.mxu0 %v2940_v0 }
  0x62   :  { %600 = vmatprep.mubr.f32.mxu1 %v2940_v0  ;;  %2165 = vmatprep.subr.bf16.mxu0 %v3024_v29 }
  0x63   :  { %530 = vmatmul.mubr.f32.vlgmr.msra.gmra.mrb[0].mxu0 %v2940_v0  ;;  %2197 = vmatprep.subr.bf16.mxu1 %v3026_v30 }
  0x64   :  { %601 = vmatmul.mubr.f32.vlgmr.msra.gmra.mrb[0].mxu1 %v2940_v0  ;;  %2167 = vmatpush1.bf16.msra.mxu0 %v3031_v35 }
  0x65   :  { %2199 = vmatpush1.bf16.msra.mxu1 %v3034_v38  ;;  %2169 = vmatprep.subr.bf16.mxu0 %v3037_v42 }
  0x66   :  { %2201 = vmatprep.subr.bf16.mxu1 %v3043_v47  ;;  %706 = vmatprep.mubr.f32.mxu0 %v2940_v0 }
  0x67   :  { %777 = vmatprep.mubr.f32.mxu1 %v2940_v0 }
  0x68   :  { %2171 = vmatpush1.bf16.msra.mxu0 %v3047_v50 }
  0x69   :  { %2203 = vmatpush1.bf16.msra.mxu1 %v3051_v54  ;;  %2173 = vmatprep.subr.bf16.mxu0 %v3055_v57 }
  0x6a   :  { %2205 = vmatprep.subr.bf16.mxu1 %v3059_v60 }
  0x6c   :  { %2175 = vmatpush1.bf16.msra.mxu0 %v3066_v1 }
  0x6d   :  { %2207 = vmatpush1.bf16.msra.mxu1 %v3070_v4  ;;  %2177 = vmatprep.subr.bf16.mxu0 %v3074_v7 }
  0x6e   :  { %2209 = vmatprep.subr.bf16.mxu1 %v3078_v10 }
  0x70   :  { %2179 = vmatpush1.bf16.msra.mxu0 %v3085_v14 }
  0x71   :  { %2211 = vmatpush1.bf16.msra.mxu1 %v3089_v17  ;;  %2181 = vmatprep.subr.bf16.mxu0 %v3093_v20 }
  0x72   :  { %2213 = vmatprep.subr.bf16.mxu1 %v3097_v23 }
  0x74   :  { %2183 = vmatpush1.bf16.msra.mxu0 %v3104_v27 }
  0x75   :  { %2215 = vmatpush1.bf16.msra.mxu1 %v3108_v32  ;;  %2185 = vmatprep.subr.bf16.mxu0 %v3112_v36 }
  0x76   :  { %2217 = vmatprep.subr.bf16.mxu1 %v3116_v40 }
  0x78   :  { %2187 = vmatpush1.bf16.msra.mxu0 %v3123_v45 }
  0x79   :  { %2219 = vmatpush1.bf16.msra.mxu1 %v3127_v49  ;;  %2189 = vmatprep.subr.bf16.mxu0 %v3131_v53 }
  0x7a   :  { %2221 = vmatprep.subr.bf16.mxu1 %v3135_v58 }
  0x7c   :  { %2191 = vmatpush1.bf16.msra.mxu0 %v3142_v63 }
  0x7d   :  { %2223 = vmatpush1.bf16.msra.mxu1 %v3146_v5  ;;  %2193 = vmatprep.subr.bf16.mxu0 %v3150_v9 }
  0x7e   :  { %2225 = vmatprep.subr.bf16.mxu1 %v3154_v13 }
  0x80   :  { %2195 = vmatpush1.bf16.msra.mxu0 %v3161_v16 }
  0x81   :  { %2227 = vmatpush1.bf16.msra.mxu1 %v3165_v18  ;;  %2229 = vmatprep.subr.bf16.mxu0 %v3024_v29 }
  0x82   :  { %2261 = vmatprep.subr.bf16.mxu1 %v3026_v30 }
 0x136   :  { %v531_v31 = vpop.f32.mrb[0].mxu0 }
 0x137   :  { %v2636_v33 = vadd.f32 %v531_v31, %v3217_v26  ;;  %v602_v37 = vpop.f32.mrb[0].mxu1  ;;  %v533_v39 = vpop.f32.mrb[1].mxu0 }
 0x138   :  { %v2637_v41 = vadd.f32 %v533_v39, %v3219_v28  ;;  %v604_v43 = vpop.f32.mrb[1].mxu1  ;;  %v2652_v52 = vadd.f32 %v602_v37, %v3223_v48 }
 0x139   :  { %v2007_v44 = vmul.f32 -1.442695, %v2636_v33  ;;  %v2653_v61 = vadd.f32 %v604_v43, %v3226_v55 }
 0x13a   :  { %v2008_v46 = vmul.f32 -1.442695, %v2637_v41  ;;  %v2009_v56 = vmul.f32 -1.442695, %v2652_v52 }
 0x13b   :  { %2711 = vpow2.f32 %v2007_v44 }
 0x13c   :  { %2713 = vpow2.f32 %v2008_v46 }
 0x13d   :  { %2715 = vpow2.f32 %v2009_v56 }
 0x145   :  { %v2712_v59 = vpop.eup %2711 }
 0x146   :  { %v614_v62 = vadd.f32 1.0, %v2712_v59  ;;  %v2714_v2 = vpop.eup %2713 }
 0x147   :  { %v620_v3 = vadd.f32 1.0, %v2714_v2  ;;  %v2716_v6 = vpop.eup %2715 }
 0x148   :  { %2717 = vrcp.f32 %v614_v62  ;;  %v626_v19 = vadd.f32 1.0, %v2716_v6 }
 0x149   :  { %2719 = vtanh.f32 %v2653_v61 }
 0x14a   :  { %2721 = vrcp.f32 %v620_v3 }
 0x14b   :  { %2723 = vrcp.f32 %v626_v19 }
 0x152   :  { %v2718_v8 = vpop.eup %2717 }
 0x153   :  { %v2720_v11 = vpop.eup %2719  ;;  %v630_v12 = vmul.f32 0.0, %v2718_v8 }
 0x154   :  { %v2722_v15 = vpop.eup %2721 }
 0x155   :  { %v631_v21 = vmul.f32 %v2722_v15, %v2720_v11  ;;  %v2724_v24 = vpop.eup %2723 }
 0x157   :  { %v3229_v22 = vadd.f32 %v631_v21, %v630_v12 }
 0x159   :  { %2725 = vtanh.f32 %v3229_v22 }
 0x163   :  { %v2726_v25 = vpop.eup %2725 }
 0x164   :  { %v634_v31 = vmul.f32 %v2726_v25, %v2724_v24 }
 0x166   :  { %707 = vmatmul.mubr.f32.vlgmr.msra.gmra.mrb[2].mxu0 %v634_v31  ;;  %778 = vmatmul.mubr.f32.vlgmr.msra.gmra.mrb[2].mxu1 %v634_v31 }
 0x167   :  { %2231 = vmatpush1.bf16.msra.mxu0 %v3031_v35  ;;  %2263 = vmatpush1.bf16.msra.mxu1 %v3034_v38 }
 0x168   :  { %2233 = vmatprep.subr.bf16.mxu0 %v3037_v42  ;;  %2265 = vmatprep.subr.bf16.mxu1 %v3043_v47 }
 0x169   :  { %883 = vmatprep.mubr.f32.mxu0 %v2940_v0  ;;  %954 = vmatprep.mubr.f32.mxu1 %v2940_v0 }
 0x16b   :  { %2235 = vmatpush1.bf16.msra.mxu0 %v3047_v50  ;;  %2267 = vmatpush1.bf16.msra.mxu1 %v3051_v54 }
 0x16c   :  { %2237 = vmatprep.subr.bf16.mxu0 %v3055_v57  ;;  %2269 = vmatprep.subr.bf16.mxu1 %v3059_v60 }
 0x16f   :  { %2239 = vmatpush1.bf16.msra.mxu0 %v3066_v1  ;;  %2271 = vmatpush1.bf16.msra.mxu1 %v3070_v4 }
 0x170   :  { %2241 = vmatprep.subr.bf16.mxu0 %v3074_v7  ;;  %2273 = vmatprep.subr.bf16.mxu1 %v3078_v10 }
 0x173   :  { %2243 = vmatpush1.bf16.msra.mxu0 %v3085_v14  ;;  %2275 = vmatpush1.bf16.msra.mxu1 %v3089_v17 }
 0x174   :  { %2245 = vmatprep.subr.bf16.mxu0 %v3093_v20  ;;  %2277 = vmatprep.subr.bf16.mxu1 %v3097_v23 }
 0x177   :  { %2247 = vmatpush1.bf16.msra.mxu0 %v3104_v27  ;;  %2279 = vmatpush1.bf16.msra.mxu1 %v3108_v32 }
 0x178   :  { %2249 = vmatprep.subr.bf16.mxu0 %v3112_v36  ;;  %2281 = vmatprep.subr.bf16.mxu1 %v3116_v40 }
 0x17b   :  { %2251 = vmatpush1.bf16.msra.mxu0 %v3123_v45  ;;  %2283 = vmatpush1.bf16.msra.mxu1 %v3127_v49 }
 0x17c   :  { %2253 = vmatprep.subr.bf16.mxu0 %v3131_v53  ;;  %2285 = vmatprep.subr.bf16.mxu1 %v3135_v58 }
 0x17f   :  { %2255 = vmatpush1.bf16.msra.mxu0 %v3142_v63  ;;  %2287 = vmatpush1.bf16.msra.mxu1 %v3146_v5 }
 0x180   :  { %2257 = vmatprep.subr.bf16.mxu0 %v3150_v9  ;;  %2289 = vmatprep.subr.bf16.mxu1 %v3154_v13 }
 0x183   :  { %2259 = vmatpush1.bf16.msra.mxu0 %v3161_v16  ;;  %2291 = vmatpush1.bf16.msra.mxu1 %v3165_v18 }
 0x184   :  { %2293 = vmatprep.subr.bf16.mxu0 %v3024_v29  ;;  %2325 = vmatprep.subr.bf16.mxu1 %v3026_v30 }
 0x239   :  { %v708_v33 = vpop.f32.mrb[2].mxu0  ;;  %v779_v34 = vpop.f32.mrb[2].mxu1 }
 0x23a   :  { %v2638_v37 = vadd.f32 %v708_v33, %v3217_v26  ;;  %v710_v39 = vpop.f32.mrb[3].mxu0  ;;  %v781_v41 = vpop.f32.mrb[3].mxu1  ;;  %v2654_v51 = vadd.f32 %v779_v34, %v3223_v48 }
 0x23b   :  { %v2639_v43 = vadd.f32 %v710_v39, %v3219_v28  ;;  %v2655_v59 = vadd.f32 %v781_v41, %v3226_v55 }
 0x23c   :  { %v2010_v44 = vmul.f32 -1.442695, %v2638_v37  ;;  %v2012_v52 = vmul.f32 -1.442695, %v2654_v51 }
 0x23d   :  { %v2011_v46 = vmul.f32 -1.442695, %v2639_v43 }
 0x23e   :  { %2727 = vpow2.f32 %v2010_v44 }
 0x23f   :  { %2729 = vpow2.f32 %v2011_v46 }
 0x240   :  { %2731 = vpow2.f32 %v2012_v52 }
 0x248   :  { %v2728_v56 = vpop.eup %2727 }
 0x249   :  { %v791_v61 = vadd.f32 1.0, %v2728_v56  ;;  %v2730_v62 = vpop.eup %2729 }
 0x24a   :  { %v797_v2 = vadd.f32 1.0, %v2730_v62  ;;  %v2732_v3 = vpop.eup %2731 }
 0x24b   :  { %2733 = vrcp.f32 %v791_v61  ;;  %v803_v15 = vadd.f32 1.0, %v2732_v3 }
 0x24c   :  { %2735 = vtanh.f32 %v2655_v59 }
 0x24d   :  { %2737 = vrcp.f32 %v797_v2 }
 0x24e   :  { %2739 = vrcp.f32 %v803_v15 }
 0x255   :  { %v2734_v6 = vpop.eup %2733 }
 0x256   :  { %v2736_v8 = vpop.eup %2735  ;;  %v807_v11 = vmul.f32 %v2734_v6, %v3229_v22 }
 0x257   :  { %v2738_v12 = vpop.eup %2737 }
 0x258   :  { %v808_v19 = vmul.f32 %v2738_v12, %v2736_v8  ;;  %v2740_v24 = vpop.eup %2739 }
 0x25a   :  { %v3271_v21 = vadd.f32 %v808_v19, %v807_v11 }
 0x25c   :  { %2741 = vtanh.f32 %v3271_v21 }
 0x266   :  { %v2742_v25 = vpop.eup %2741 }
 0x267   :  { %v811_v31 = vmul.f32 %v2742_v25, %v2740_v24 }
 0x269   :  { %884 = vmatmul.mubr.f32.vlgmr.msra.gmra.mrb[4].mxu0 %v811_v31  ;;  %955 = vmatmul.mubr.f32.vlgmr.msra.gmra.mrb[4].mxu1 %v811_v31 }
 0x26a   :  { %2295 = vmatpush1.bf16.msra.mxu0 %v3031_v35  ;;  %2327 = vmatpush1.bf16.msra.mxu1 %v3034_v38 }
 0x26b   :  { %2297 = vmatprep.subr.bf16.mxu0 %v3037_v42  ;;  %2329 = vmatprep.subr.bf16.mxu1 %v3043_v47 }
 0x26c   :  { %1060 = vmatprep.mubr.f32.mxu0 %v2940_v0  ;;  %1131 = vmatprep.mubr.f32.mxu1 %v2940_v0 }
 0x26e   :  { %2299 = vmatpush1.bf16.msra.mxu0 %v3047_v50  ;;  %2331 = vmatpush1.bf16.msra.mxu1 %v3051_v54 }
 0x26f   :  { %2301 = vmatprep.subr.bf16.mxu0 %v3055_v57  ;;  %2333 = vmatprep.subr.bf16.mxu1 %v3059_v60 }
 0x272   :  { %2303 = vmatpush1.bf16.msra.mxu0 %v3066_v1  ;;  %2335 = vmatpush1.bf16.msra.mxu1 %v3070_v4 }
 0x273   :  { %2305 = vmatprep.subr.bf16.mxu0 %v3074_v7  ;;  %2337 = vmatprep.subr.bf16.mxu1 %v3078_v10 }
 0x276   :  { %2307 = vmatpush1.bf16.msra.mxu0 %v3085_v14  ;;  %2339 = vmatpush1.bf16.msra.mxu1 %v3089_v17 }
 0x277   :  { %2309 = vmatprep.subr.bf16.mxu0 %v3093_v20  ;;  %2341 = vmatprep.subr.bf16.mxu1 %v3097_v23 }
 0x27a   :  { %2311 = vmatpush1.bf16.msra.mxu0 %v3104_v27  ;;  %2343 = vmatpush1.bf16.msra.mxu1 %v3108_v32 }
 0x27b   :  { %2313 = vmatprep.subr.bf16.mxu0 %v3112_v36  ;;  %2345 = vmatprep.subr.bf16.mxu1 %v3116_v40 }
 0x27e   :  { %2315 = vmatpush1.bf16.msra.mxu0 %v3123_v45  ;;  %2347 = vmatpush1.bf16.msra.mxu1 %v3127_v49 }
 0x27f   :  { %2317 = vmatprep.subr.bf16.mxu0 %v3131_v53  ;;  %2349 = vmatprep.subr.bf16.mxu1 %v3135_v58 }
 0x282   :  { %2319 = vmatpush1.bf16.msra.mxu0 %v3142_v63  ;;  %2351 = vmatpush1.bf16.msra.mxu1 %v3146_v5 }
 0x283   :  { %2321 = vmatprep.subr.bf16.mxu0 %v3150_v9  ;;  %2353 = vmatprep.subr.bf16.mxu1 %v3154_v13 }
 0x286   :  { %2323 = vmatpush1.bf16.msra.mxu0 %v3161_v16  ;;  %2355 = vmatpush1.bf16.msra.mxu1 %v3165_v18 }
 0x287   :  { %2357 = vmatprep.subr.bf16.mxu0 %v3024_v29  ;;  %2389 = vmatprep.subr.bf16.mxu1 %v3026_v30 }
 0x33c   :  { %v885_v22 = vpop.f32.mrb[4].mxu0  ;;  %v956_v33 = vpop.f32.mrb[4].mxu1 }
 0x33d   :  { %v2640_v34 = vadd.f32 %v885_v22, %v3217_v26  ;;  %v887_v37 = vpop.f32.mrb[5].mxu0  ;;  %v958_v39 = vpop.f32.mrb[5].mxu1  ;;  %v2656_v46 = vadd.f32 %v956_v33, %v3223_v48 }
 0x33e   :  { %v2641_v41 = vadd.f32 %v887_v37, %v3219_v28  ;;  %v2657_v56 = vadd.f32 %v958_v39, %v3226_v55 }
 0x33f   :  { %v2013_v43 = vmul.f32 -1.442695, %v2640_v34  ;;  %v2015_v51 = vmul.f32 -1.442695, %v2656_v46 }
 0x340   :  { %v2014_v44 = vmul.f32 -1.442695, %v2641_v41 }
 0x341   :  { %2743 = vpow2.f32 %v2013_v43 }
 0x342   :  { %2745 = vpow2.f32 %v2014_v44 }
 0x343   :  { %2747 = vpow2.f32 %v2015_v51 }
 0x34b   :  { %v2744_v52 = vpop.eup %2743 }
 0x34c   :  { %v968_v59 = vadd.f32 1.0, %v2744_v52  ;;  %v2746_v61 = vpop.eup %2745 }
 0x34d   :  { %v974_v62 = vadd.f32 1.0, %v2746_v61  ;;  %v2748_v2 = vpop.eup %2747 }
 0x34e   :  { %2749 = vrcp.f32 %v968_v59  ;;  %v980_v12 = vadd.f32 1.0, %v2748_v2 }
 0x34f   :  { %2751 = vtanh.f32 %v2657_v56 }
 0x350   :  { %2753 = vrcp.f32 %v974_v62 }
 0x351   :  { %2755 = vrcp.f32 %v980_v12 }
 0x358   :  { %v2750_v3 = vpop.eup %2749 }
 0x359   :  { %v2752_v6 = vpop.eup %2751  ;;  %v984_v8 = vmul.f32 %v2750_v3, %v3271_v21 }
 0x35a   :  { %v2754_v11 = vpop.eup %2753 }
 0x35b   :  { %v985_v15 = vmul.f32 %v2754_v11, %v2752_v6  ;;  %v2756_v24 = vpop.eup %2755 }
 0x35d   :  { %v3313_v19 = vadd.f32 %v985_v15, %v984_v8 }
 0x35f   :  { %2757 = vtanh.f32 %v3313_v19 }
 0x369   :  { %v2758_v25 = vpop.eup %2757 }
 0x36a   :  { %v988_v31 = vmul.f32 %v2758_v25, %v2756_v24 }
 0x36c   :  { %1061 = vmatmul.mubr.f32.vlgmr.msra.gmra.mrb[6].mxu0 %v988_v31  ;;  %1132 = vmatmul.mubr.f32.vlgmr.msra.gmra.mrb[6].mxu1 %v988_v31 }
 0x36d   :  { %2359 = vmatpush1.bf16.msra.mxu0 %v3031_v35  ;;  %2391 = vmatpush1.bf16.msra.mxu1 %v3034_v38 }
 0x36e   :  { %2361 = vmatprep.subr.bf16.mxu0 %v3037_v42  ;;  %2393 = vmatprep.subr.bf16.mxu1 %v3043_v47 }
 0x36f   :  { %1237 = vmatprep.mubr.f32.mxu0 %v2940_v0  ;;  %1308 = vmatprep.mubr.f32.mxu1 %v2940_v0 }
 0x371   :  { %2363 = vmatpush1.bf16.msra.mxu0 %v3047_v50  ;;  %2395 = vmatpush1.bf16.msra.mxu1 %v3051_v54 }
 0x372   :  { %2365 = vmatprep.subr.bf16.mxu0 %v3055_v57  ;;  %2397 = vmatprep.subr.bf16.mxu1 %v3059_v60 }
 0x375   :  { %2367 = vmatpush1.bf16.msra.mxu0 %v3066_v1  ;;  %2399 = vmatpush1.bf16.msra.mxu1 %v3070_v4 }
 0x376   :  { %2369 = vmatprep.subr.bf16.mxu0 %v3074_v7  ;;  %2401 = vmatprep.subr.bf16.mxu1 %v3078_v10 }
 0x379   :  { %2371 = vmatpush1.bf16.msra.mxu0 %v3085_v14  ;;  %2403 = vmatpush1.bf16.msra.mxu1 %v3089_v17 }
 0x37a   :  { %2373 = vmatprep.subr.bf16.mxu0 %v3093_v20  ;;  %2405 = vmatprep.subr.bf16.mxu1 %v3097_v23 }
 0x37d   :  { %2375 = vmatpush1.bf16.msra.mxu0 %v3104_v27  ;;  %2407 = vmatpush1.bf16.msra.mxu1 %v3108_v32 }
 0x37e   :  { %2377 = vmatprep.subr.bf16.mxu0 %v3112_v36  ;;  %2409 = vmatprep.subr.bf16.mxu1 %v3116_v40 }
 0x381   :  { %2379 = vmatpush1.bf16.msra.mxu0 %v3123_v45  ;;  %2411 = vmatpush1.bf16.msra.mxu1 %v3127_v49 }
 0x382   :  { %2381 = vmatprep.subr.bf16.mxu0 %v3131_v53  ;;  %2413 = vmatprep.subr.bf16.mxu1 %v3135_v58 }
 0x385   :  { %2383 = vmatpush1.bf16.msra.mxu0 %v3142_v63  ;;  %2415 = vmatpush1.bf16.msra.mxu1 %v3146_v5 }
 0x386   :  { %2385 = vmatprep.subr.bf16.mxu0 %v3150_v9  ;;  %2417 = vmatprep.subr.bf16.mxu1 %v3154_v13 }
 0x389   :  { %2387 = vmatpush1.bf16.msra.mxu0 %v3161_v16  ;;  %2419 = vmatpush1.bf16.msra.mxu1 %v3165_v18 }
 0x38a   :  { %2421 = vmatprep.subr.bf16.mxu0 %v3024_v29  ;;  %2453 = vmatprep.subr.bf16.mxu1 %v3026_v30 }
 0x43f   :  { %v1062_v21 = vpop.f32.mrb[6].mxu0  ;;  %v1133_v22 = vpop.f32.mrb[6].mxu1 }
 0x440   :  { %v2642_v33 = vadd.f32 %v1062_v21, %v3217_v26  ;;  %v1064_v34 = vpop.f32.mrb[7].mxu0  ;;  %v1135_v37 = vpop.f32.mrb[7].mxu1  ;;  %v2658_v44 = vadd.f32 %v1133_v22, %v3223_v48 }
 0x441   :  { %v2643_v39 = vadd.f32 %v1064_v34, %v3219_v28  ;;  %v2659_v52 = vadd.f32 %v1135_v37, %v3226_v55 }
 0x442   :  { %v2016_v41 = vmul.f32 -1.442695, %v2642_v33  ;;  %v2018_v46 = vmul.f32 -1.442695, %v2658_v44 }
 0x443   :  { %v2017_v43 = vmul.f32 -1.442695, %v2643_v39 }
 0x444   :  { %2759 = vpow2.f32 %v2016_v41 }
 0x445   :  { %2761 = vpow2.f32 %v2017_v43 }
 0x446   :  { %2763 = vpow2.f32 %v2018_v46 }
 0x44e   :  { %v2760_v51 = vpop.eup %2759 }
 0x44f   :  { %v1145_v56 = vadd.f32 1.0, %v2760_v51  ;;  %v2762_v59 = vpop.eup %2761 }
 0x450   :  { %v1151_v61 = vadd.f32 1.0, %v2762_v59  ;;  %v2764_v62 = vpop.eup %2763 }
 0x451   :  { %2765 = vrcp.f32 %v1145_v56  ;;  %v1157_v11 = vadd.f32 1.0, %v2764_v62 }
 0x452   :  { %2767 = vtanh.f32 %v2659_v52 }
 0x453   :  { %2769 = vrcp.f32 %v1151_v61 }
 0x454   :  { %2771 = vrcp.f32 %v1157_v11 }
 0x45b   :  { %v2766_v2 = vpop.eup %2765 }
 0x45c   :  { %v2768_v3 = vpop.eup %2767  ;;  %v1161_v6 = vmul.f32 %v2766_v2, %v3313_v19 }
 0x45d   :  { %v2770_v8 = vpop.eup %2769 }
 0x45e   :  { %v1162_v12 = vmul.f32 %v2770_v8, %v2768_v3  ;;  %v2772_v24 = vpop.eup %2771 }
 0x460   :  { %v3355_v15 = vadd.f32 %v1162_v12, %v1161_v6 }
 0x462   :  { %2773 = vtanh.f32 %v3355_v15 }
 0x46c   :  { %v2774_v25 = vpop.eup %2773 }
 0x46d   :  { %v1165_v31 = vmul.f32 %v2774_v25, %v2772_v24 }
 0x46f   :  { %1238 = vmatmul.mubr.f32.vlgmr.msra.gmra.mrb[8].mxu0 %v1165_v31  ;;  %1309 = vmatmul.mubr.f32.vlgmr.msra.gmra.mrb[8].mxu1 %v1165_v31 }
 0x470   :  { %2423 = vmatpush1.bf16.msra.mxu0 %v3031_v35  ;;  %2455 = vmatpush1.bf16.msra.mxu1 %v3034_v38 }
 0x471   :  { %2425 = vmatprep.subr.bf16.mxu0 %v3037_v42  ;;  %2457 = vmatprep.subr.bf16.mxu1 %v3043_v47 }
 0x472   :  { %1414 = vmatprep.mubr.f32.mxu0 %v2940_v0  ;;  %1485 = vmatprep.mubr.f32.mxu1 %v2940_v0 }
 0x474   :  { %2427 = vmatpush1.bf16.msra.mxu0 %v3047_v50  ;;  %2459 = vmatpush1.bf16.msra.mxu1 %v3051_v54 }
 0x475   :  { %2429 = vmatprep.subr.bf16.mxu0 %v3055_v57  ;;  %2461 = vmatprep.subr.bf16.mxu1 %v3059_v60 }
 0x478   :  { %2431 = vmatpush1.bf16.msra.mxu0 %v3066_v1  ;;  %2463 = vmatpush1.bf16.msra.mxu1 %v3070_v4 }
 0x479   :  { %2433 = vmatprep.subr.bf16.mxu0 %v3074_v7  ;;  %2465 = vmatprep.subr.bf16.mxu1 %v3078_v10 }
 0x47c   :  { %2435 = vmatpush1.bf16.msra.mxu0 %v3085_v14  ;;  %2467 = vmatpush1.bf16.msra.mxu1 %v3089_v17 }
 0x47d   :  { %2437 = vmatprep.subr.bf16.mxu0 %v3093_v20  ;;  %2469 = vmatprep.subr.bf16.mxu1 %v3097_v23 }
 0x480   :  { %2439 = vmatpush1.bf16.msra.mxu0 %v3104_v27  ;;  %2471 = vmatpush1.bf16.msra.mxu1 %v3108_v32 }
 0x481   :  { %2441 = vmatprep.subr.bf16.mxu0 %v3112_v36  ;;  %2473 = vmatprep.subr.bf16.mxu1 %v3116_v40 }
 0x484   :  { %2443 = vmatpush1.bf16.msra.mxu0 %v3123_v45  ;;  %2475 = vmatpush1.bf16.msra.mxu1 %v3127_v49 }
 0x485   :  { %2445 = vmatprep.subr.bf16.mxu0 %v3131_v53  ;;  %2477 = vmatprep.subr.bf16.mxu1 %v3135_v58 }
 0x488   :  { %2447 = vmatpush1.bf16.msra.mxu0 %v3142_v63  ;;  %2479 = vmatpush1.bf16.msra.mxu1 %v3146_v5 }
 0x489   :  { %2449 = vmatprep.subr.bf16.mxu0 %v3150_v9  ;;  %2481 = vmatprep.subr.bf16.mxu1 %v3154_v13 }
 0x48c   :  { %2451 = vmatpush1.bf16.msra.mxu0 %v3161_v16  ;;  %2483 = vmatpush1.bf16.msra.mxu1 %v3165_v18 }
 0x48d   :  { %2485 = vmatprep.subr.bf16.mxu0 %v3024_v29  ;;  %2517 = vmatprep.subr.bf16.mxu1 %v3026_v30 }
 0x542   :  { %v1239_v19 = vpop.f32.mrb[8].mxu0  ;;  %v1310_v21 = vpop.f32.mrb[8].mxu1 }
 0x543   :  { %v2644_v22 = vadd.f32 %v1239_v19, %v3217_v26  ;;  %v1241_v33 = vpop.f32.mrb[9].mxu0  ;;  %v1312_v34 = vpop.f32.mrb[9].mxu1  ;;  %v2660_v43 = vadd.f32 %v1310_v21, %v3223_v48 }
 0x544   :  { %v2645_v37 = vadd.f32 %v1241_v33, %v3219_v28  ;;  %v2661_v51 = vadd.f32 %v1312_v34, %v3226_v55 }
 0x545   :  { %v2019_v39 = vmul.f32 -1.442695, %v2644_v22  ;;  %v2021_v44 = vmul.f32 -1.442695, %v2660_v43 }
 0x546   :  { %v2020_v41 = vmul.f32 -1.442695, %v2645_v37 }
 0x547   :  { %2775 = vpow2.f32 %v2019_v39 }
 0x548   :  { %2777 = vpow2.f32 %v2020_v41 }
 0x549   :  { %2779 = vpow2.f32 %v2021_v44 }
 0x551   :  { %v2776_v46 = vpop.eup %2775 }
 0x552   :  { %v1322_v52 = vadd.f32 1.0, %v2776_v46  ;;  %v2778_v56 = vpop.eup %2777 }
 0x553   :  { %v1328_v59 = vadd.f32 1.0, %v2778_v56  ;;  %v2780_v61 = vpop.eup %2779 }
 0x554   :  { %2781 = vrcp.f32 %v1322_v52  ;;  %v1334_v8 = vadd.f32 1.0, %v2780_v61 }
 0x555   :  { %2783 = vtanh.f32 %v2661_v51 }
 0x556   :  { %2785 = vrcp.f32 %v1328_v59 }
 0x557   :  { %2787 = vrcp.f32 %v1334_v8 }
 0x55e   :  { %v2782_v62 = vpop.eup %2781 }
 0x55f   :  { %v2784_v2 = vpop.eup %2783  ;;  %v1338_v3 = vmul.f32 %v2782_v62, %v3355_v15 }
 0x560   :  { %v2786_v6 = vpop.eup %2785 }
 0x561   :  { %v1339_v11 = vmul.f32 %v2786_v6, %v2784_v2  ;;  %v2788_v24 = vpop.eup %2787 }
 0x563   :  { %v3397_v12 = vadd.f32 %v1339_v11, %v1338_v3 }
 0x565   :  { %2789 = vtanh.f32 %v3397_v12 }
 0x56f   :  { %v2790_v25 = vpop.eup %2789 }
 0x570   :  { %v1342_v31 = vmul.f32 %v2790_v25, %v2788_v24  ;;  %v1877_v25 = vld [vmem:[#allocation8 + $0x18] sm:$0xff] }
 0x572   :  { %1415 = vmatmul.mubr.f32.vlgmr.msra.gmra.mrb[10].mxu0 %v1342_v31  ;;  %1486 = vmatmul.mubr.f32.vlgmr.msra.gmra.mrb[10].mxu1 %v1342_v31 }
 0x573   :  { %2487 = vmatpush1.bf16.msra.mxu0 %v3031_v35  ;;  %2519 = vmatpush1.bf16.msra.mxu1 %v3034_v38 }
 0x574   :  { %2489 = vmatprep.subr.bf16.mxu0 %v3037_v42  ;;  %2521 = vmatprep.subr.bf16.mxu1 %v3043_v47 }
 0x575   :  { %1591 = vmatprep.mubr.f32.mxu0 %v2940_v0  ;;  %1662 = vmatprep.mubr.f32.mxu1 %v2940_v0 }
 0x577   :  { %2491 = vmatpush1.bf16.msra.mxu0 %v3047_v50  ;;  %2523 = vmatpush1.bf16.msra.mxu1 %v3051_v54 }
 0x578   :  { %2493 = vmatprep.subr.bf16.mxu0 %v3055_v57  ;;  %2525 = vmatprep.subr.bf16.mxu1 %v3059_v60 }
 0x57b   :  { %2495 = vmatpush1.bf16.msra.mxu0 %v3066_v1  ;;  %2527 = vmatpush1.bf16.msra.mxu1 %v3070_v4 }
 0x57c   :  { %2497 = vmatprep.subr.bf16.mxu0 %v3074_v7  ;;  %2529 = vmatprep.subr.bf16.mxu1 %v3078_v10 }
 0x57f   :  { %2499 = vmatpush1.bf16.msra.mxu0 %v3085_v14  ;;  %2531 = vmatpush1.bf16.msra.mxu1 %v3089_v17 }
 0x580   :  { %2501 = vmatprep.subr.bf16.mxu0 %v3093_v20  ;;  %2533 = vmatprep.subr.bf16.mxu1 %v3097_v23 }
 0x583   :  { %2503 = vmatpush1.bf16.msra.mxu0 %v3104_v27  ;;  %2535 = vmatpush1.bf16.msra.mxu1 %v3108_v32 }
 0x584   :  { %2505 = vmatprep.subr.bf16.mxu0 %v3112_v36  ;;  %2537 = vmatprep.subr.bf16.mxu1 %v3116_v40 }
 0x587   :  { %2507 = vmatpush1.bf16.msra.mxu0 %v3123_v45  ;;  %2539 = vmatpush1.bf16.msra.mxu1 %v3127_v49 }
 0x588   :  { %2509 = vmatprep.subr.bf16.mxu0 %v3131_v53  ;;  %2541 = vmatprep.subr.bf16.mxu1 %v3135_v58 }
 0x58b   :  { %2511 = vmatpush1.bf16.msra.mxu0 %v3142_v63  ;;  %2543 = vmatpush1.bf16.msra.mxu1 %v3146_v5 }
 0x58c   :  { %2513 = vmatprep.subr.bf16.mxu0 %v3150_v9  ;;  %2545 = vmatprep.subr.bf16.mxu1 %v3154_v13 }
 0x58f   :  { %2515 = vmatpush1.bf16.msra.mxu0 %v3161_v16  ;;  %2547 = vmatpush1.bf16.msra.mxu1 %v3165_v18 }
 0x590   :  { %2549 = vmatprep.subr.bf16.mxu0 %v3024_v29  ;;  %2581 = vmatprep.subr.bf16.mxu1 %v3026_v30 }
 0x645   :  { %v1416_v15 = vpop.f32.mrb[10].mxu0  ;;  %v1487_v19 = vpop.f32.mrb[10].mxu1 }
 0x646   :  { %v2646_v21 = vadd.f32 %v1416_v15, %v3217_v26  ;;  %v1418_v22 = vpop.f32.mrb[11].mxu0  ;;  %v1489_v33 = vpop.f32.mrb[11].mxu1  ;;  %v2662_v41 = vadd.f32 %v1487_v19, %v3223_v48  ;;  %v1878_v15 = vld [vmem:[#allocation8 + $0x20] sm:$0xff]  ;;  %v1879_v19 = vld [vmem:[#allocation8 + $0x28] sm:$0xff] }
 0x647   :  { %v2647_v34 = vadd.f32 %v1418_v22, %v3219_v28  ;;  %v2663_v29 = vadd.f32 %v1489_v33, %v3226_v55  ;;  %v1880_v22 = vld [vmem:[#allocation8 + $0x30] sm:$0xff]  ;;  %v1881_v33 = vld [vmem:[#allocation8 + $0x38] sm:$0xff] }
 0x648   :  { %v2022_v37 = vmul.f32 -1.442695, %v2646_v21  ;;  %v2024_v43 = vmul.f32 -1.442695, %v2662_v41  ;;  %v2619_v21 = vpack.c.bf16 %v1879_v19, %v1878_v15 }
 0x649   :  { %v2023_v39 = vmul.f32 -1.442695, %v2647_v34  ;;  %v2622_v34 = vpack.c.bf16 %v1881_v33, %v1880_v22 }
 0x64a   :  { %2791 = vpow2.f32 %v2022_v37  ;;  %v1882_v37 = vld [vmem:[#allocation8 + $0x40] sm:$0xff] }
 0x64b   :  { %2793 = vpow2.f32 %v2023_v39  ;;  %v1883_v39 = vld [vmem:[#allocation8 + $0x48] sm:$0xff] }
 0x64c   :  { %2795 = vpow2.f32 %v2024_v43  ;;  %v2625_v41 = vpack.c.bf16 %v1883_v39, %v1882_v37  ;;  %v1884_v43 = vld [vmem:[#allocation8 + $0x50] sm:$0xff] }
 0x654   :  { %v2792_v44 = vpop.eup %2791 }
 0x655   :  { %v1499_v46 = vadd.f32 1.0, %v2792_v44  ;;  %v2794_v30 = vpop.eup %2793  ;;  %v1885_v44 = vld [vmem:[#allocation8 + $0x58] sm:$0xff] }
 0x656   :  { %v1505_v51 = vadd.f32 1.0, %v2794_v30  ;;  %v2796_v52 = vpop.eup %2795  ;;  %v1887_v30 = vld [vmem:[#allocation8 + $0x68] sm:$0xff] }
 0x657   :  { %2797 = vrcp.f32 %v1499_v46  ;;  %v1511_v2 = vadd.f32 1.0, %v2796_v52  ;;  %v1886_v46 = vld [vmem:[#allocation8 + $0x60] sm:$0xff]  ;;  %v1888_v52 = vld [vmem:[#allocation8 + $0x70] sm:$0xff] }
 0x658   :  { %2799 = vtanh.f32 %v2663_v29  ;;  %v2628_v29 = vpack.c.bf16 %v1885_v44, %v1884_v43 }
 0x659   :  { %2801 = vrcp.f32 %v1505_v51  ;;  %v2631_v51 = vpack.c.bf16 %v1887_v30, %v1886_v46 }
 0x65a   :  { %2803 = vrcp.f32 %v1511_v2 }
 0x661   :  { %v2798_v56 = vpop.eup %2797 }
 0x662   :  { %v2800_v59 = vpop.eup %2799  ;;  %v1515_v61 = vmul.f32 %v2798_v56, %v3397_v12  ;;  %v1876_v12 = vld [vmem:[#allocation8 + $0x10] sm:$0xff]  ;;  %v1889_v56 = vld [vmem:[#allocation8 + $0x78] sm:$0xff] }
 0x663   :  { %v2802_v62 = vpop.eup %2801  ;;  %v2616_v31 = vpack.c.bf16 %v1877_v25, %v1876_v12 }
 0x664   :  { %v1516_v3 = vmul.f32 %v2802_v62, %v2800_v59  ;;  %v2804_v8 = vpop.eup %2803  ;;  %v2634_v59 = vpack.c.bf16 %v1889_v56, %v1888_v52 }
 0x666   :  { %v3439_v6 = vadd.f32 %v1516_v3, %v1515_v61 }
 0x668   :  { %2805 = vtanh.f32 %v3439_v6 }
 0x672   :  { %v2806_v11 = vpop.eup %2805 }
 0x673   :  { %v1519_v24 = vmul.f32 %v2806_v11, %v2804_v8 }
 0x675   :  { %1592 = vmatmul.mubr.f32.vlgmr.msra.gmra.mrb[12].mxu0 %v1519_v24  ;;  %1663 = vmatmul.mubr.f32.vlgmr.msra.gmra.mrb[12].mxu1 %v1519_v24 }
 0x676   :  { %2551 = vmatpush1.bf16.msra.mxu0 %v3031_v35  ;;  %2583 = vmatpush1.bf16.msra.mxu1 %v3034_v38 }
 0x677   :  { %2553 = vmatprep.subr.bf16.mxu0 %v3037_v42  ;;  %2585 = vmatprep.subr.bf16.mxu1 %v3043_v47 }
 0x678   :  { %1768 = vmatprep.mubr.f32.mxu0 %v2940_v0  ;;  %1839 = vmatprep.mubr.f32.mxu1 %v2940_v0 }
 0x67a   :  { %2555 = vmatpush1.bf16.msra.mxu0 %v3047_v50  ;;  %2587 = vmatpush1.bf16.msra.mxu1 %v3051_v54 }
 0x67b   :  { %2557 = vmatprep.subr.bf16.mxu0 %v3055_v57  ;;  %2589 = vmatprep.subr.bf16.mxu1 %v3059_v60 }
 0x67e   :  { %2559 = vmatpush1.bf16.msra.mxu0 %v3066_v1  ;;  %2591 = vmatpush1.bf16.msra.mxu1 %v3070_v4 }
 0x67f   :  { %2561 = vmatprep.subr.bf16.mxu0 %v3074_v7  ;;  %2593 = vmatprep.subr.bf16.mxu1 %v3078_v10 }
 0x682   :  { %2563 = vmatpush1.bf16.msra.mxu0 %v3085_v14  ;;  %2595 = vmatpush1.bf16.msra.mxu1 %v3089_v17 }
 0x683   :  { %2565 = vmatprep.subr.bf16.mxu0 %v3093_v20  ;;  %2597 = vmatprep.subr.bf16.mxu1 %v3097_v23 }
 0x686   :  { %2567 = vmatpush1.bf16.msra.mxu0 %v3104_v27  ;;  %2599 = vmatpush1.bf16.msra.mxu1 %v3108_v32 }
 0x687   :  { %2569 = vmatprep.subr.bf16.mxu0 %v3112_v36  ;;  %2601 = vmatprep.subr.bf16.mxu1 %v3116_v40 }
 0x68a   :  { %2571 = vmatpush1.bf16.msra.mxu0 %v3123_v45  ;;  %2603 = vmatpush1.bf16.msra.mxu1 %v3127_v49 }
 0x68b   :  { %2573 = vmatprep.subr.bf16.mxu0 %v3131_v53  ;;  %2605 = vmatprep.subr.bf16.mxu1 %v3135_v58 }
 0x68e   :  { %2575 = vmatpush1.bf16.msra.mxu0 %v3142_v63  ;;  %2607 = vmatpush1.bf16.msra.mxu1 %v3146_v5 }
 0x68f   :  { %2577 = vmatprep.subr.bf16.mxu0 %v3150_v9  ;;  %2609 = vmatprep.subr.bf16.mxu1 %v3154_v13  ;;  %v1874_v9 = vld [vmem:[#allocation8] sm:$0xff]  ;;  %v1875_v13 = vld [vmem:[#allocation8 + $0x8] sm:$0xff] }
 0x692   :  { %2579 = vmatpush1.bf16.msra.mxu0 %v3161_v16  ;;  %2611 = vmatpush1.bf16.msra.mxu1 %v3165_v18  ;;  %v2613_v16 = vpack.c.bf16 %v1875_v13, %v1874_v9  ;;  %v2941_v18 = vmov 0.0|0.0  }
 0x693   :  { %2612 = vmatprep.subr.bf16.mxu0 %v2941_v18 }
 0x748   :  { %v1593_v35 = vpop.f32.mrb[12].mxu0  ;;  %v1664_v38 = vpop.f32.mrb[12].mxu1 }
 0x749   :  { %v2648_v42 = vadd.f32 %v1593_v35, %v3217_v26  ;;  %v1595_v47 = vpop.f32.mrb[13].mxu0  ;;  %v1666_v50 = vpop.f32.mrb[13].mxu1  ;;  %v2664_v1 = vadd.f32 %v1664_v38, %v3223_v48 }
 0x74a   :  { %v2649_v54 = vadd.f32 %v1595_v47, %v3219_v28  ;;  %v2665_v10 = vadd.f32 %v1666_v50, %v3226_v55 }
 0x74b   :  { %v2025_v57 = vmul.f32 -1.442695, %v2648_v42  ;;  %v2027_v4 = vmul.f32 -1.442695, %v2664_v1 }
 0x74c   :  { %v2026_v60 = vmul.f32 -1.442695, %v2649_v54 }
 0x74d   :  { %2807 = vpow2.f32 %v2025_v57 }
 0x74e   :  { %2809 = vpow2.f32 %v2026_v60 }
 0x74f   :  { %2811 = vpow2.f32 %v2027_v4 }
 0x757   :  { %v2808_v7 = vpop.eup %2807 }
 0x758   :  { %v1676_v14 = vadd.f32 1.0, %v2808_v7  ;;  %v2810_v17 = vpop.eup %2809 }
 0x759   :  { %v1682_v20 = vadd.f32 1.0, %v2810_v17  ;;  %v2812_v23 = vpop.eup %2811  ;;  %v2031_v17 = vld [vmem:[%s3508_s5] ss:$0 sm:$0xff] }
 0x75a   :  { %2813 = vrcp.f32 %v1676_v14  ;;  %v1688_v45 = vadd.f32 1.0, %v2812_v23 }
 0x75b   :  { %2815 = vtanh.f32 %v2665_v10 }
 0x75c   :  { %2817 = vrcp.f32 %v1682_v20 }
 0x75d   :  { %2819 = vrcp.f32 %v1688_v45 }
 0x764   :  { %v2814_v27 = vpop.eup %2813 }
 0x765   :  { %v2816_v32 = vpop.eup %2815  ;;  %v1692_v36 = vmul.f32 %v2814_v27, %v3439_v6 }
 0x766   :  { %v2818_v40 = vpop.eup %2817 }
 0x767   :  { %v1693_v49 = vmul.f32 %v2818_v40, %v2816_v32  ;;  %v2820_v58 = vpop.eup %2819 }
 0x769   :  { %v3479_v53 = vadd.f32 %v1693_v49, %v1692_v36 }
 0x76b   :  { %2821 = vtanh.f32 %v3479_v53 }
 0x775   :  { %v2822_v63 = vpop.eup %2821 }
 0x776   :  { %v1696_v5 = vmul.f32 %v2822_v63, %v2820_v58 }
 0x778   :  { %1769 = vmatmul.mubr.f32.vlgmr.msra.gmra.mrb[14].mxu0 %v1696_v5  ;;  %1840 = vmatmul.mubr.f32.vlgmr.msra.gmra.mrb[14].mxu1 %v1696_v5 }
 0x779   :  { %2614 = vmatpush3.bf16.msra.mxu0 %v2613_v16  ;;  %2081 = vmatprep.mubr.msk.f32.mxu0 %vm2942_vm1, %v2940_v0 }
 0x77a   :  { %2615 = vmatprep.subr.bf16.mxu0 %v2941_v18 }
 0x77d   :  { %2617 = vmatpush3.bf16.msra.mxu0 %v2616_v31 }
 0x77e   :  { %2618 = vmatprep.subr.bf16.mxu0 %v2941_v18 }
 0x781   :  { %2620 = vmatpush3.bf16.msra.mxu0 %v2619_v21 }
 0x782   :  { %2621 = vmatprep.subr.bf16.mxu0 %v2941_v18 }
 0x785   :  { %2623 = vmatpush3.bf16.msra.mxu0 %v2622_v34 }
 0x786   :  { %2624 = vmatprep.subr.bf16.mxu0 %v2941_v18 }
 0x789   :  { %2626 = vmatpush3.bf16.msra.mxu0 %v2625_v41 }
 0x78a   :  { %2627 = vmatprep.subr.bf16.mxu0 %v2941_v18 }
 0x78d   :  { %2629 = vmatpush3.bf16.msra.mxu0 %v2628_v29 }
 0x78e   :  { %2630 = vmatprep.subr.bf16.mxu0 %v2941_v18 }
 0x791   :  { %2632 = vmatpush3.bf16.msra.mxu0 %v2631_v51 }
 0x792   :  { %2633 = vmatprep.subr.bf16.mxu0 %v2941_v18 }
 0x795   :  { %2635 = vmatpush3.bf16.msra.mxu0 %v2634_v59 }
 0x84b   :  { %v1770_v61 = vpop.f32.mrb[14].mxu0  ;;  %v1841_v62 = vpop.f32.mrb[14].mxu1 }
 0x84c   :  { %v2650_v2 = vadd.f32 %v1770_v61, %v3217_v26  ;;  %v1772_v3 = vpop.f32.mrb[15].mxu0  ;;  %v1843_v6 = vpop.f32.mrb[15].mxu1  ;;  %v2666_v0 = vadd.f32 %v1841_v62, %v3223_v48 }
 0x84d   :  { %v2651_v8 = vadd.f32 %v1772_v3, %v3219_v28  ;;  %v2667_v42 = vadd.f32 %v1843_v6, %v3226_v55 }
 0x84e   :  { %v2028_v11 = vmul.f32 -1.442695, %v2650_v2  ;;  %v2030_v35 = vmul.f32 -1.442695, %v2666_v0 }
 0x84f   :  { %v2029_v24 = vmul.f32 -1.442695, %v2651_v8 }
 0x850   :  { %2823 = vpow2.f32 %v2028_v11 }
 0x851   :  { %2825 = vpow2.f32 %v2029_v24 }
 0x852   :  { %2827 = vpow2.f32 %v2030_v35 }
 0x85a   :  { %v2824_v38 = vpop.eup %2823 }
 0x85b   :  { %v1853_v47 = vadd.f32 1.0, %v2824_v38  ;;  %v2826_v50 = vpop.eup %2825 }
 0x85c   :  { %v1859_v54 = vadd.f32 1.0, %v2826_v50  ;;  %v2828_v26 = vpop.eup %2827 }
 0x85d   :  { %2829 = vrcp.f32 %v1853_v47  ;;  %v1865_v4 = vadd.f32 1.0, %v2828_v26 }
 0x85e   :  { %2831 = vtanh.f32 %v2667_v42 }
 0x85f   :  { %2833 = vrcp.f32 %v1859_v54 }
 0x860   :  { %2835 = vrcp.f32 %v1865_v4 }
 0x867   :  { %v2830_v57 = vpop.eup %2829 }
 0x868   :  { %v2832_v28 = vpop.eup %2831  ;;  %v1869_v60 = vmul.f32 %v2830_v57, %v3479_v53 }
 0x869   :  { %v2834_v1 = vpop.eup %2833 }
 0x86a   :  { %v1870_v7 = vmul.f32 %v2834_v1, %v2832_v28  ;;  %v2836_v10 = vpop.eup %2835 }
 0x86c   :  { %v1871_v48 = vadd.f32 %v1870_v7, %v1869_v60 }
 0x86e   :  { %2837 = vtanh.f32 %v1871_v48 }
 0x878   :  { %v2838_v55 = vpop.eup %2837 }
 0x879   :  { %v1873_v14 = vmul.f32 %v2838_v55, %v2836_v10 }
 0x87b   :  { %2082 = vmatmul.mubr.f32.vlgmr.msra.gmra.mrb[16].mxu0 %v1873_v14 }
 0x94e   :  { %v1963_v20 = vpop.f32.mrb[16].mxu0 }
 0x94f   :  { %v1964_v23 = vadd.f32 %v2031_v17, %v1963_v20  ;;  %v2083_v27 = vpop.f32.mrb[17].mxu0 }
 0x951   :  { %1967 = vst [vmem:[#allocation9] sm:$0xff] %v1964_v23 }
 0x952   :  { %2916 = shalt.err (!%p2913_p0)
}
 0x953   :  { %s2917_s1 = scalar_lea.hbm %s3509_s6, 128 }
 0x954   :  { %p2918_p1 = scmp.ne.s32.totalorder %s3509_s6, %s2917_s1  ;;  %p2921_p2 = scmp.lt.u32.totalorder %s2917_s1, %s3509_s6 }
 0x956   :  { %p2923_p3 = pnand %p2921_p2, %p2918_p1 }
 0x958   :  { %2926 = shalt.err (!%p2923_p3)
}
 0x959   :  { %1977 = dma.vmem_to_hbm [thread:$0]  %s1975_s29, 128, %s3509_s6, [#allocation5]  }
 0x95a   :  { %2931 = dma.done.wait [#allocation5], 128  }
 0x95b   :  { %2932 = vsyncadd [#allocation5], 4294967168 }
 0x95c   :  { %1981 = vsyncpa [#allocation4], 1 }
 0x95d   :  { %1982 = vsyncpa [#allocation7], 1 }
 0x95e   :  { %1983 = vsyncpa [#allocation5], 1 }

</bundles_post_ra>
